<compile_context>
chip_gen: v7x
topology: tpu7x:2x2x1
jax: 0.10.0
libtpu: 0.0.40
codegen_flags: <defaults>
</compile_context>

<pallas_src>
import functools

import jax
import jax.numpy as jnp
from jax.experimental import pallas as pl
from jax.experimental.pallas import tpu as pltpu

BN_EPS = 1e-5  # nn.BatchNorm3d default


# ---------------------------------------------------------------------------
# Fused (BN+ReLU pre-activation) -> Conv3d pass as one banded matmul per n.
# Grid = (N,); everything depth/height/width lives inside one kernel step.
# ---------------------------------------------------------------------------
def _make_conv_kernel(k, pad, compute_stats, add_residual):
    def kernel(*refs):
        it = iter(refs)
        x_ref = next(it)                                  # (D, H, W*Cin) bf16/f32
        b_ref = next(it)                                  # (k*k*W*Cin, W*Cout) bf16
        scale_ref = next(it)                              # (1, W*Cin) f32 BN scale
        shift_ref = next(it)                              # (1, W*Cin) f32 BN shift
        bias_ref = next(it) if add_residual else None     # (1, W*Cout) f32
        res_ref = next(it) if add_residual else None      # (D, H, W*Cout) f32
        out_ref = next(it)                                # (D, H, W*Cout)
        stats_ref = next(it) if compute_stats else None   # (2, W*Cout) f32

        D, H, wc = x_ref.shape

        # Pre-activation of the previous stage: BN(scale, shift) + ReLU, fused.
        # Cast to bf16 exactly once for the MXU.
        scale = scale_ref[...].reshape(1, 1, wc)
        shift = shift_ref[...].reshape(1, 1, wc)
        act = jnp.maximum(x_ref[...].astype(jnp.float32) * scale + shift, 0.0)
        act = act.astype(jnp.bfloat16)                    # (D, H, W*Cin)

        # Zero halo added in registers (no padded activations ever hit HBM).
        if pad:
            zh = jnp.zeros((D, pad, wc), jnp.bfloat16)
            a = jnp.concatenate([zh, act, zh], axis=1)            # (D, H+2p, WC)
            zd = jnp.zeros((pad, H + 2 * pad, wc), jnp.bfloat16)
            a = jnp.concatenate([zd, a, zd], axis=0)              # (D+2p, H+2p, WC)
        else:
            a = act

        # One fat MXU matmul: (D*H, k*k*WC) @ (k*k*WC, WC).  Each (kd, kh) tap
        # slice (the only sublane-shifted relayouts) is built exactly once.
        pieces = [a[kd:kd + D, kh:kh + H, :].reshape(D * H, wc)
                  for kd in range(k) for kh in range(k)]
        lhs = jnp.concatenate(pieces, axis=-1)                    # (D*H, k*k*WC)
        y = jnp.dot(lhs, b_ref[...], preferred_element_type=jnp.float32)

        if add_residual:
            y = y + bias_ref[...] + res_ref[...].reshape(D * H, wc)

        if compute_stats:
            # Per-lane sum / sum-of-squares of this sample's f32 output -> BN
            # stats for the next stage without re-reading y1 from HBM.
            s = jnp.sum(y, axis=0, keepdims=True)                 # (1, WC)
            sq = jnp.sum(y * y, axis=0, keepdims=True)            # (1, WC)
            stats_ref[...] = jnp.concatenate([s, sq], axis=0)     # (2, WC)

        out_ref[...] = y.reshape(D, H, wc).astype(out_ref.dtype)

    return kernel


def _conv_pass(x_slab, b_flat, scale_row, shift_row, *, N, D, H, WC, k, pad,
               out_dtype, compute_stats=False, bias_row=None, residual=None):
    add_residual = residual is not None
    kernel = _make_conv_kernel(k, pad, compute_stats, add_residual)

    in_specs = [
        pl.BlockSpec((None, D, H, WC), lambda n: (n, 0, 0, 0)),
        pl.BlockSpec((k * k * WC, WC), lambda n: (0, 0)),   # weight stays resident
        pl.BlockSpec((1, WC), lambda n: (0, 0)),
        pl.BlockSpec((1, WC), lambda n: (0, 0)),
    ]
    inputs = [x_slab, b_flat, scale_row, shift_row]
    if add_residual:
        in_specs.append(pl.BlockSpec((1, WC), lambda n: (0, 0)))
        inputs.append(bias_row)
        in_specs.append(pl.BlockSpec((None, D, H, WC), lambda n: (n, 0, 0, 0)))
        inputs.append(residual)

    y_spec = pl.BlockSpec((None, D, H, WC), lambda n: (n, 0, 0, 0))
    if compute_stats:
        out_shape = (jax.ShapeDtypeStruct((N, D, H, WC), out_dtype),
                     jax.ShapeDtypeStruct((N, 2, WC), jnp.float32))
        out_specs = (y_spec, pl.BlockSpec((None, 2, WC), lambda n: (n, 0, 0)))
    else:
        out_shape = jax.ShapeDtypeStruct((N, D, H, WC), out_dtype)
        out_specs = y_spec

    return pl.pallas_call(
        kernel,
        out_shape=out_shape,
        grid_spec=pltpu.PrefetchScalarGridSpec(
            num_scalar_prefetch=0,
            grid=(N,),
            in_specs=in_specs,
            out_specs=out_specs,
        ),
        # Per-n outputs only -> no cross-step accumulation; megacore-safe.
        compiler_params=pltpu.CompilerParams(dimension_semantics=("parallel",)),
    )(*inputs)


# ---------------------------------------------------------------------------
# JAX-side parameter / layout glue.
# ---------------------------------------------------------------------------
def _banded_weight(weight, W, pad):
    """(Cout, Cin, k, k, k) -> flat banded matrix (k*k*W*Cin, W*Cout).

    B[(kd*k+kh)*W*Cin + w_in*Cin + ci, w_out*Cout + co]
      = weight[co, ci, kd, kh, w_in - w_out + pad], 0 if the tap lies outside
      the kernel (which also implements the zero padding along W for free).
    """
    cout, cin, k = weight.shape[0], weight.shape[1], weight.shape[2]
    w_in = jnp.arange(W)[:, None]
    w_out = jnp.arange(W)[None, :]
    kw = w_in - w_out + pad                                   # (W, W)
    valid = (kw >= 0) & (kw < k)
    kw_c = jnp.clip(kw, 0, k - 1)
    wp = jnp.transpose(weight, (2, 3, 4, 1, 0))               # (kd, kh, kw, Cin, Cout)
    g = wp[:, :, kw_c, :, :]                                  # (kd, kh, Win, Wout, Cin, Cout)
    g = jnp.where(valid[None, None, :, :, None, None], g, 0.0)
    g = jnp.transpose(g, (0, 1, 2, 4, 3, 5))                  # (kd, kh, Win, Cin, Wout, Cout)
    return g.reshape(k * k * W * cin, W * cout)


def _per_channel_row(v, W):
    # lane index = w*C + c  ->  tile the per-channel vector W times.
    return jnp.tile(v.astype(jnp.float32), (W,)).reshape(1, -1)


def resblock3d_forward(x, w1, b1, g1, beta1, w2, b2, g2, beta2,
                       *, kernel_size=3, padding=1):
    """ResBlock3D forward with train-mode BatchNorm3d batch statistics.

    x: (N, C, D, H, W);  w*: (C, C, k, k, k);  b*/g*/beta*: (C,).
    """
    N, C, D, H, W = x.shape
    k, p = kernel_size, padding
    assert 2 * p == k - 1, "ResBlock3D preserves spatial resolution (2*pad == k-1)"
    WC = W * C
    cnt = float(N * D * H * W)

    # Channels-last slab; lane dim = W*C (128 lanes for the demo shapes).
    # Single f32 copy serves as conv1 input AND conv2 residual.
    x32 = x.astype(jnp.float32)
    x_slab = jnp.transpose(x32, (0, 2, 3, 4, 1)).reshape(N, D, H, WC)

    def bn_scale_shift(sum_c, sumsq_c, gamma, beta):
        mean = sum_c / cnt
        var = sumsq_c / cnt - mean * mean                    # biased (train-mode BN)
        scale = gamma.astype(jnp.float32) * jax.lax.rsqrt(var + BN_EPS)
        shift = beta.astype(jnp.float32) - mean * scale
        return _per_channel_row(scale, W), _per_channel_row(shift, W)

    # ---- BN1 batch stats directly from x (fuses with the layout transpose in
    #      XLA; no separate Pallas stats pass re-reading the activation).
    s1 = jnp.sum(x32, axis=(0, 2, 3, 4))
    sq1 = jnp.sum(x32 * x32, axis=(0, 2, 3, 4))
    scale1, shift1 = bn_scale_shift(s1, sq1, g1, beta1)

    b1_flat = _banded_weight(w1.astype(jnp.float32), W, p).astype(jnp.bfloat16)
    b2_flat = _banded_weight(w2.astype(jnp.float32), W, p).astype(jnp.bfloat16)

    # ---- conv1(relu(bn1(x))); per-lane sum/sumsq of y1 accumulated in-kernel.
    # TODO(synk): conv1's bias b1 is intentionally dropped - train-mode BN2
    # subtracts the batch mean, which cancels any per-channel constant exactly.
    y1, stats2_per_n = _conv_pass(
        x_slab, b1_flat, scale1, shift1,
        N=N, D=D, H=H, WC=WC, k=k, pad=p,
        out_dtype=jnp.bfloat16, compute_stats=True)

    stats2 = jnp.sum(stats2_per_n, axis=0).reshape(2, W, C).sum(axis=1)   # (2, C)
    scale2, shift2 = bn_scale_shift(stats2[0], stats2[1], g2, beta2)

    # ---- conv2(relu(bn2(y1))) + bias2 + x   (residual epilogue fused).
    out_slab = _conv_pass(
        y1, b2_flat, scale2, shift2,
        N=N, D=D, H=H, WC=WC, k=k, pad=p,
        out_dtype=jnp.float32,
        bias_row=_per_channel_row(b2, W), residual=x_slab)

    out = out_slab.reshape(N, D, H, W, C)
    return jnp.transpose(out, (0, 4, 1, 2, 3))                 # back to NCDHW
    # TODO(synk): running_mean/running_var momentum updates are training-only
    # buffer bookkeeping and do not affect this forward output; omitted.


# ---------------------------------------------------------------------------
# Pure-JAX reference mirroring the PyTorch forward (train-mode BN, f32).
# ---------------------------------------------------------------------------
def resblock3d_reference(x, w1, b1, g1, beta1, w2, b2, g2, beta2, padding=1):
    def bn_relu(v, gamma, beta):
        mean = jnp.mean(v, axis=(0, 2, 3, 4), keepdims=True)
        var = jnp.mean((v - mean) ** 2, axis=(0, 2, 3, 4), keepdims=True)
        v = (v - mean) * jax.lax.rsqrt(var + BN_EPS)
        v = v * gamma.reshape(1, -1, 1, 1, 1) + beta.reshape(1, -1, 1, 1, 1)
        return jnp.maximum(v, 0.0)

    def conv(v, w, b):
        return jax.lax.conv_general_dilated(
            v, w.astype(jnp.float32), window_strides=(1, 1, 1),
            padding=((padding, padding),) * 3,
            dimension_numbers=("NCDHW", "OIDHW", "NCDHW"),
        ) + b.reshape(1, -1, 1, 1, 1)

    x32 = x.astype(jnp.float32)
    out = conv(bn_relu(x32, g1, beta1), w1, b1)
    out = conv(bn_relu(out, g2, beta2), w2, b2)
    return out + x32


if __name__ == "__main__":
    in_features, ksize, padding = 8, 3, 1
    N, D, H, W = 2, 8, 16, 16

    key = jax.random.PRNGKey(0)
    ks = jax.random.split(key, 9)
    x = jax.random.normal(ks[0], (N, in_features, D, H, W), jnp.float32)
    w1 = 0.1 * jax.random.normal(ks[1], (in_features, in_features, ksize, ksize, ksize), jnp.float32)
    b1 = 0.05 * jax.random.normal(ks[2], (in_features,), jnp.float32)
    w2 = 0.1 * jax.random.normal(ks[3], (in_features, in_features, ksize, ksize, ksize), jnp.float32)
    b2 = 0.05 * jax.random.normal(ks[4], (in_features,), jnp.float32)
    g1 = 1.0 + 0.1 * jax.random.normal(ks[5], (in_features,), jnp.float32)
    beta1 = 0.1 * jax.random.normal(ks[6], (in_features,), jnp.float32)
    g2 = 1.0 + 0.1 * jax.random.normal(ks[7], (in_features,), jnp.float32)
    beta2 = 0.1 * jax.random.normal(ks[8], (in_features,), jnp.float32)

    fwd = jax.jit(functools.partial(resblock3d_forward,
                                    kernel_size=ksize, padding=padding))
    out = jax.block_until_ready(fwd(x, w1, b1, g1, beta1, w2, b2, g2, beta2))

    ref = resblock3d_reference(x, w1, b1, g1, beta1, w2, b2, g2, beta2, padding=padding)
    assert out.shape == (N, in_features, D, H, W)
    max_err = float(jnp.max(jnp.abs(out - ref)))
    assert jnp.allclose(out, ref, rtol=3e-2, atol=3e-2), f"mismatch vs reference: {max_err}"

    print("KERNEL_OK")
</pallas_src>

<mosaic_0001>
module attributes {stable_mosaic.version = 11 : i64} {
  func.func @kernel(%arg0: i32, %arg1: memref<1x8x16x128xf32, #tpu.memory_space<vmem>>, %arg2: memref<1152x128xbf16, #tpu.memory_space<vmem>>, %arg3: memref<1x128xf32, #tpu.memory_space<vmem>>, %arg4: memref<1x128xf32, #tpu.memory_space<vmem>>, %arg5: memref<1x8x16x128xbf16, #tpu.memory_space<vmem>>, %arg6: memref<1x2x128xf32, #tpu.memory_space<vmem>>) attributes {dimension_semantics = [#tpu.dimension_semantics<parallel>], iteration_bounds = array<i64: 2>, scalar_prefetch = 0 : i64, scratch_operands = 0 : i64, tpu.core_type = #tpu.core_type<tc>, window_params = [{transform_indices = @transform_0, window_bounds = array<i64: 1, 8, 16, 128>}, {pipeline_mode = #tpu.pipeline_mode<synchronous>, transform_indices = @transform_1, window_bounds = array<i64: 1152, 128>}, {pipeline_mode = #tpu.pipeline_mode<synchronous>, transform_indices = @transform_2, window_bounds = array<i64: 1, 128>}, {pipeline_mode = #tpu.pipeline_mode<synchronous>, transform_indices = @transform_3, window_bounds = array<i64: 1, 128>}, {transform_indices = @transform_4, window_bounds = array<i64: 1, 8, 16, 128>}, {transform_indices = @transform_5, window_bounds = array<i64: 1, 2, 128>}]} {
    %c0 = arith.constant 0 : index
    %c0_0 = arith.constant 0 : index
    %0 = vector.load %arg3[%c0, %c0_0] : memref<1x128xf32, #tpu.memory_space<vmem>>, vector<1x128xf32>
    %1 = vector.shape_cast %0 : vector<1x128xf32> to vector<1x1x128xf32>
    %c0_1 = arith.constant 0 : index
    %c0_2 = arith.constant 0 : index
    %2 = vector.load %arg4[%c0_1, %c0_2] : memref<1x128xf32, #tpu.memory_space<vmem>>, vector<1x128xf32>
    %3 = vector.shape_cast %2 : vector<1x128xf32> to vector<1x1x128xf32>
    %c0_3 = arith.constant 0 : index
    %c0_4 = arith.constant 0 : index
    %c0_5 = arith.constant 0 : index
    %c0_6 = arith.constant 0 : index
    %4 = vector.load %arg1[%c0_3, %c0_4, %c0_5, %c0_6] : memref<1x8x16x128xf32, #tpu.memory_space<vmem>>, vector<1x8x16x128xf32>
    %5 = vector.shape_cast %4 : vector<1x8x16x128xf32> to vector<8x16x128xf32>
    %6 = vector.broadcast %1 : vector<1x1x128xf32> to vector<8x16x128xf32>
    %7 = arith.mulf %5, %6 : vector<8x16x128xf32>
    %8 = vector.broadcast %3 : vector<1x1x128xf32> to vector<8x16x128xf32>
    %9 = arith.addf %7, %8 : vector<8x16x128xf32>
    %cst = arith.constant 0.000000e+00 : f32
    %10 = vector.broadcast %cst : f32 to vector<8x16x128xf32>
    %11 = arith.maximumf %9, %10 : vector<8x16x128xf32>
    %12 = arith.truncf %11 : vector<8x16x128xf32> to vector<8x16x128xbf16>
    %cst_7 = arith.constant 0.000000e+00 : bf16
    %13 = vector.broadcast %cst_7 : bf16 to vector<8x1x128xbf16>
    %14 = tpu.concatenate %13, %12, %13 in 1 : vector<8x1x128xbf16>, vector<8x16x128xbf16>, vector<8x1x128xbf16> -> vector<8x18x128xbf16>
    %cst_8 = arith.constant 0.000000e+00 : bf16
    %15 = vector.broadcast %cst_8 : bf16 to vector<1x18x128xbf16>
    %16 = tpu.concatenate %15, %14, %15 in 0 : vector<1x18x128xbf16>, vector<8x18x128xbf16>, vector<1x18x128xbf16> -> vector<10x18x128xbf16>
    %17 = vector.extract_strided_slice %16 {offsets = [0, 0, 0], sizes = [8, 16, 128], strides = [1, 1, 1]} : vector<10x18x128xbf16> to vector<8x16x128xbf16>
    %18 = vector.shape_cast %17 : vector<8x16x128xbf16> to vector<128x128xbf16>
    %19 = vector.extract_strided_slice %16 {offsets = [0, 1, 0], sizes = [8, 16, 128], strides = [1, 1, 1]} : vector<10x18x128xbf16> to vector<8x16x128xbf16>
    %20 = vector.shape_cast %19 : vector<8x16x128xbf16> to vector<128x128xbf16>
    %21 = vector.extract_strided_slice %16 {offsets = [0, 2, 0], sizes = [8, 16, 128], strides = [1, 1, 1]} : vector<10x18x128xbf16> to vector<8x16x128xbf16>
    %22 = vector.shape_cast %21 : vector<8x16x128xbf16> to vector<128x128xbf16>
    %23 = vector.extract_strided_slice %16 {offsets = [1, 0, 0], sizes = [8, 16, 128], strides = [1, 1, 1]} : vector<10x18x128xbf16> to vector<8x16x128xbf16>
    %24 = vector.shape_cast %23 : vector<8x16x128xbf16> to vector<128x128xbf16>
    %25 = vector.extract_strided_slice %16 {offsets = [1, 1, 0], sizes = [8, 16, 128], strides = [1, 1, 1]} : vector<10x18x128xbf16> to vector<8x16x128xbf16>
    %26 = vector.shape_cast %25 : vector<8x16x128xbf16> to vector<128x128xbf16>
    %27 = vector.extract_strided_slice %16 {offsets = [1, 2, 0], sizes = [8, 16, 128], strides = [1, 1, 1]} : vector<10x18x128xbf16> to vector<8x16x128xbf16>
    %28 = vector.shape_cast %27 : vector<8x16x128xbf16> to vector<128x128xbf16>
    %29 = vector.extract_strided_slice %16 {offsets = [2, 0, 0], sizes = [8, 16, 128], strides = [1, 1, 1]} : vector<10x18x128xbf16> to vector<8x16x128xbf16>
    %30 = vector.shape_cast %29 : vector<8x16x128xbf16> to vector<128x128xbf16>
    %31 = vector.extract_strided_slice %16 {offsets = [2, 1, 0], sizes = [8, 16, 128], strides = [1, 1, 1]} : vector<10x18x128xbf16> to vector<8x16x128xbf16>
    %32 = vector.shape_cast %31 : vector<8x16x128xbf16> to vector<128x128xbf16>
    %33 = vector.extract_strided_slice %16 {offsets = [2, 2, 0], sizes = [8, 16, 128], strides = [1, 1, 1]} : vector<10x18x128xbf16> to vector<8x16x128xbf16>
    %34 = vector.shape_cast %33 : vector<8x16x128xbf16> to vector<128x128xbf16>
    %35 = tpu.concatenate %18, %20, %22, %24, %26, %28, %30, %32, %34 in 1 : vector<128x128xbf16>, vector<128x128xbf16>, vector<128x128xbf16>, vector<128x128xbf16>, vector<128x128xbf16>, vector<128x128xbf16>, vector<128x128xbf16>, vector<128x128xbf16>, vector<128x128xbf16> -> vector<128x1152xbf16>
    %c0_9 = arith.constant 0 : index
    %c0_10 = arith.constant 0 : index
    %36 = vector.load %arg2[%c0_9, %c0_10] : memref<1152x128xbf16, #tpu.memory_space<vmem>>, vector<1152x128xbf16>
    %cst_11 = arith.constant dense<0.000000e+00> : vector<128x128xf32>
    %37 = tpu.matmul %35, %36, %cst_11 {dimension_numbers = #tpu.dot_dimension_numbers<[1], [0], [0], [1], [0, 0, 1, 1], [], []>} : vector<128x1152xbf16>, vector<1152x128xbf16>, vector<128x128xf32> -> vector<128x128xf32>
    %cst_12 = arith.constant dense<0.000000e+00> : vector<128xf32>
    %38 = vector.multi_reduction <add>, %37, %cst_12 [0] : vector<128x128xf32> to vector<128xf32>
    %39 = vector.shape_cast %38 : vector<128xf32> to vector<1x128xf32>
    %40 = arith.mulf %37, %37 : vector<128x128xf32>
    %cst_13 = arith.constant dense<0.000000e+00> : vector<128xf32>
    %41 = vector.multi_reduction <add>, %40, %cst_13 [0] : vector<128x128xf32> to vector<128xf32>
    %42 = vector.shape_cast %41 : vector<128xf32> to vector<1x128xf32>
    %43 = tpu.concatenate %39, %42 in 0 : vector<1x128xf32>, vector<1x128xf32> -> vector<2x128xf32>
    %c0_14 = arith.constant 0 : index
    %c0_15 = arith.constant 0 : index
    %c0_16 = arith.constant 0 : index
    %44 = vector.load %arg6[%c0_14, %c0_15, %c0_16] : memref<1x2x128xf32, #tpu.memory_space<vmem>>, vector<1x2x128xf32>
    %45 = vector.shape_cast %44 : vector<1x2x128xf32> to vector<2x128xf32>
    %46 = vector.shape_cast %43 : vector<2x128xf32> to vector<1x2x128xf32>
    tpu.vector_store %arg6[%c0_14, %c0_15, %c0_16], %46 {strides = array<i32>} : memref<1x2x128xf32, #tpu.memory_space<vmem>>, vector<1x2x128xf32>,
    %47 = vector.shape_cast %37 : vector<128x128xf32> to vector<8x16x128xf32>
    %48 = arith.truncf %47 : vector<8x16x128xf32> to vector<8x16x128xbf16>
    %c0_17 = arith.constant 0 : index
    %c0_18 = arith.constant 0 : index
    %c0_19 = arith.constant 0 : index
    %c0_20 = arith.constant 0 : index
    %49 = vector.load %arg5[%c0_17, %c0_18, %c0_19, %c0_20] : memref<1x8x16x128xbf16, #tpu.memory_space<vmem>>, vector<1x8x16x128xbf16>
    %50 = vector.shape_cast %49 : vector<1x8x16x128xbf16> to vector<8x16x128xbf16>
    %51 = vector.shape_cast %48 : vector<8x16x128xbf16> to vector<1x8x16x128xbf16>
    tpu.vector_store %arg5[%c0_17, %c0_18, %c0_19, %c0_20], %51 {strides = array<i32>} : memref<1x8x16x128xbf16, #tpu.memory_space<vmem>>, vector<1x8x16x128xbf16>,
    return
  }
  func.func @transform_0(%arg0: i32) -> (i32, i32, i32, i32) {
    %c0_i32 = arith.constant 0 : i32
    %c0_i32_0 = arith.constant 0 : i32
    %c0_i32_1 = arith.constant 0 : i32
    %c0_i32_2 = arith.constant 0 : i32
    return %arg0, %c0_i32, %c0_i32_0, %c0_i32_1 : i32, i32, i32, i32
  }
  func.func @transform_1(%arg0: i32) -> (i32, i32) {
    %c0_i32 = arith.constant 0 : i32
    %c0_i32_0 = arith.constant 0 : i32
    %c0_i32_1 = arith.constant 0 : i32
    return %c0_i32, %c0_i32_0 : i32, i32
  }
  func.func @transform_2(%arg0: i32) -> (i32, i32) {
    %c0_i32 = arith.constant 0 : i32
    %c0_i32_0 = arith.constant 0 : i32
    %c0_i32_1 = arith.constant 0 : i32
    return %c0_i32, %c0_i32_0 : i32, i32
  }
  func.func @transform_3(%arg0: i32) -> (i32, i32) {
    %c0_i32 = arith.constant 0 : i32
    %c0_i32_0 = arith.constant 0 : i32
    %c0_i32_1 = arith.constant 0 : i32
    return %c0_i32, %c0_i32_0 : i32, i32
  }
  func.func @transform_4(%arg0: i32) -> (i32, i32, i32, i32) {
    %c0_i32 = arith.constant 0 : i32
    %c0_i32_0 = arith.constant 0 : i32
    %c0_i32_1 = arith.constant 0 : i32
    %c0_i32_2 = arith.constant 0 : i32
    return %arg0, %c0_i32, %c0_i32_0, %c0_i32_1 : i32, i32, i32, i32
  }
  func.func @transform_5(%arg0: i32) -> (i32, i32, i32) {
    %c0_i32 = arith.constant 0 : i32
    %c0_i32_0 = arith.constant 0 : i32
    %c0_i32_1 = arith.constant 0 : i32
    return %arg0, %c0_i32, %c0_i32_0 : i32, i32, i32
  }
}

module attributes {stable_mosaic.version = 11 : i64} {
  func.func @kernel(%arg0: i32, %arg1: memref<1x8x16x128xbf16, #tpu.memory_space<vmem>>, %arg2: memref<1152x128xbf16, #tpu.memory_space<vmem>>, %arg3: memref<1x128xf32, #tpu.memory_space<vmem>>, %arg4: memref<1x128xf32, #tpu.memory_space<vmem>>, %arg5: memref<1x128xf32, #tpu.memory_space<vmem>>, %arg6: memref<1x8x16x128xf32, #tpu.memory_space<vmem>>, %arg7: memref<1x8x16x128xf32, #tpu.memory_space<vmem>>) attributes {dimension_semantics = [#tpu.dimension_semantics<parallel>], iteration_bounds = array<i64: 2>, scalar_prefetch = 0 : i64, scratch_operands = 0 : i64, tpu.core_type = #tpu.core_type<tc>, window_params = [{transform_indices = @transform_0, window_bounds = array<i64: 1, 8, 16, 128>}, {pipeline_mode = #tpu.pipeline_mode<synchronous>, transform_indices = @transform_1, window_bounds = array<i64: 1152, 128>}, {pipeline_mode = #tpu.pipeline_mode<synchronous>, transform_indices = @transform_2, window_bounds = array<i64: 1, 128>}, {pipeline_mode = #tpu.pipeline_mode<synchronous>, transform_indices = @transform_3, window_bounds = array<i64: 1, 128>}, {pipeline_mode = #tpu.pipeline_mode<synchronous>, transform_indices = @transform_4, window_bounds = array<i64: 1, 128>}, {transform_indices = @transform_5, window_bounds = array<i64: 1, 8, 16, 128>}, {transform_indices = @transform_6, window_bounds = array<i64: 1, 8, 16, 128>}]} {
    %c0 = arith.constant 0 : index
    %c0_0 = arith.constant 0 : index
    %0 = vector.load %arg3[%c0, %c0_0] : memref<1x128xf32, #tpu.memory_space<vmem>>, vector<1x128xf32>
    %1 = vector.shape_cast %0 : vector<1x128xf32> to vector<1x1x128xf32>
    %c0_1 = arith.constant 0 : index
    %c0_2 = arith.constant 0 : index
    %2 = vector.load %arg4[%c0_1, %c0_2] : memref<1x128xf32, #tpu.memory_space<vmem>>, vector<1x128xf32>
    %3 = vector.shape_cast %2 : vector<1x128xf32> to vector<1x1x128xf32>
    %c0_3 = arith.constant 0 : index
    %c0_4 = arith.constant 0 : index
    %c0_5 = arith.constant 0 : index
    %c0_6 = arith.constant 0 : index
    %4 = vector.load %arg1[%c0_3, %c0_4, %c0_5, %c0_6] : memref<1x8x16x128xbf16, #tpu.memory_space<vmem>>, vector<1x8x16x128xbf16>
    %5 = vector.shape_cast %4 : vector<1x8x16x128xbf16> to vector<8x16x128xbf16>
    %6 = arith.extf %5 : vector<8x16x128xbf16> to vector<8x16x128xf32>
    %7 = vector.broadcast %1 : vector<1x1x128xf32> to vector<8x16x128xf32>
    %8 = arith.mulf %6, %7 : vector<8x16x128xf32>
    %9 = vector.broadcast %3 : vector<1x1x128xf32> to vector<8x16x128xf32>
    %10 = arith.addf %8, %9 : vector<8x16x128xf32>
    %cst = arith.constant 0.000000e+00 : f32
    %11 = vector.broadcast %cst : f32 to vector<8x16x128xf32>
    %12 = arith.maximumf %10, %11 : vector<8x16x128xf32>
    %13 = arith.truncf %12 : vector<8x16x128xf32> to vector<8x16x128xbf16>
    %cst_7 = arith.constant 0.000000e+00 : bf16
    %14 = vector.broadcast %cst_7 : bf16 to vector<8x1x128xbf16>
    %15 = tpu.concatenate %14, %13, %14 in 1 : vector<8x1x128xbf16>, vector<8x16x128xbf16>, vector<8x1x128xbf16> -> vector<8x18x128xbf16>
    %cst_8 = arith.constant 0.000000e+00 : bf16
    %16 = vector.broadcast %cst_8 : bf16 to vector<1x18x128xbf16>
    %17 = tpu.concatenate %16, %15, %16 in 0 : vector<1x18x128xbf16>, vector<8x18x128xbf16>, vector<1x18x128xbf16> -> vector<10x18x128xbf16>
    %18 = vector.extract_strided_slice %17 {offsets = [0, 0, 0], sizes = [8, 16, 128], strides = [1, 1, 1]} : vector<10x18x128xbf16> to vector<8x16x128xbf16>
    %19 = vector.shape_cast %18 : vector<8x16x128xbf16> to vector<128x128xbf16>
    %20 = vector.extract_strided_slice %17 {offsets = [0, 1, 0], sizes = [8, 16, 128], strides = [1, 1, 1]} : vector<10x18x128xbf16> to vector<8x16x128xbf16>
    %21 = vector.shape_cast %20 : vector<8x16x128xbf16> to vector<128x128xbf16>
    %22 = vector.extract_strided_slice %17 {offsets = [0, 2, 0], sizes = [8, 16, 128], strides = [1, 1, 1]} : vector<10x18x128xbf16> to vector<8x16x128xbf16>
    %23 = vector.shape_cast %22 : vector<8x16x128xbf16> to vector<128x128xbf16>
    %24 = vector.extract_strided_slice %17 {offsets = [1, 0, 0], sizes = [8, 16, 128], strides = [1, 1, 1]} : vector<10x18x128xbf16> to vector<8x16x128xbf16>
    %25 = vector.shape_cast %24 : vector<8x16x128xbf16> to vector<128x128xbf16>
    %26 = vector.extract_strided_slice %17 {offsets = [1, 1, 0], sizes = [8, 16, 128], strides = [1, 1, 1]} : vector<10x18x128xbf16> to vector<8x16x128xbf16>
    %27 = vector.shape_cast %26 : vector<8x16x128xbf16> to vector<128x128xbf16>
    %28 = vector.extract_strided_slice %17 {offsets = [1, 2, 0], sizes = [8, 16, 128], strides = [1, 1, 1]} : vector<10x18x128xbf16> to vector<8x16x128xbf16>
    %29 = vector.shape_cast %28 : vector<8x16x128xbf16> to vector<128x128xbf16>
    %30 = vector.extract_strided_slice %17 {offsets = [2, 0, 0], sizes = [8, 16, 128], strides = [1, 1, 1]} : vector<10x18x128xbf16> to vector<8x16x128xbf16>
    %31 = vector.shape_cast %30 : vector<8x16x128xbf16> to vector<128x128xbf16>
    %32 = vector.extract_strided_slice %17 {offsets = [2, 1, 0], sizes = [8, 16, 128], strides = [1, 1, 1]} : vector<10x18x128xbf16> to vector<8x16x128xbf16>
    %33 = vector.shape_cast %32 : vector<8x16x128xbf16> to vector<128x128xbf16>
    %34 = vector.extract_strided_slice %17 {offsets = [2, 2, 0], sizes = [8, 16, 128], strides = [1, 1, 1]} : vector<10x18x128xbf16> to vector<8x16x128xbf16>
    %35 = vector.shape_cast %34 : vector<8x16x128xbf16> to vector<128x128xbf16>
    %36 = tpu.concatenate %19, %21, %23, %25, %27, %29, %31, %33, %35 in 1 : vector<128x128xbf16>, vector<128x128xbf16>, vector<128x128xbf16>, vector<128x128xbf16>, vector<128x128xbf16>, vector<128x128xbf16>, vector<128x128xbf16>, vector<128x128xbf16>, vector<128x128xbf16> -> vector<128x1152xbf16>
    %c0_9 = arith.constant 0 : index
    %c0_10 = arith.constant 0 : index
    %37 = vector.load %arg2[%c0_9, %c0_10] : memref<1152x128xbf16, #tpu.memory_space<vmem>>, vector<1152x128xbf16>
    %cst_11 = arith.constant dense<0.000000e+00> : vector<128x128xf32>
    %38 = tpu.matmul %36, %37, %cst_11 {dimension_numbers = #tpu.dot_dimension_numbers<[1], [0], [0], [1], [0, 0, 1, 1], [], []>} : vector<128x1152xbf16>, vector<1152x128xbf16>, vector<128x128xf32> -> vector<128x128xf32>
    %c0_12 = arith.constant 0 : index
    %c0_13 = arith.constant 0 : index
    %39 = vector.load %arg5[%c0_12, %c0_13] : memref<1x128xf32, #tpu.memory_space<vmem>>, vector<1x128xf32>
    %40 = vector.broadcast %39 : vector<1x128xf32> to vector<128x128xf32>
    %41 = arith.addf %38, %40 : vector<128x128xf32>
    %c0_14 = arith.constant 0 : index
    %c0_15 = arith.constant 0 : index
    %c0_16 = arith.constant 0 : index
    %c0_17 = arith.constant 0 : index
    %42 = vector.load %arg6[%c0_14, %c0_15, %c0_16, %c0_17] : memref<1x8x16x128xf32, #tpu.memory_space<vmem>>, vector<1x8x16x128xf32>
    %43 = vector.shape_cast %42 : vector<1x8x16x128xf32> to vector<8x16x128xf32>
    %44 = vector.shape_cast %43 : vector<8x16x128xf32> to vector<128x128xf32>
    %45 = arith.addf %41, %44 : vector<128x128xf32>
    %46 = vector.shape_cast %45 : vector<128x128xf32> to vector<8x16x128xf32>
    %c0_18 = arith.constant 0 : index
    %c0_19 = arith.constant 0 : index
    %c0_20 = arith.constant 0 : index
    %c0_21 = arith.constant 0 : index
    %47 = vector.load %arg7[%c0_18, %c0_19, %c0_20, %c0_21] : memref<1x8x16x128xf32, #tpu.memory_space<vmem>>, vector<1x8x16x128xf32>
    %48 = vector.shape_cast %47 : vector<1x8x16x128xf32> to vector<8x16x128xf32>
    %49 = vector.shape_cast %46 : vector<8x16x128xf32> to vector<1x8x16x128xf32>
    tpu.vector_store %arg7[%c0_18, %c0_19, %c0_20, %c0_21], %49 {strides = array<i32>} : memref<1x8x16x128xf32, #tpu.memory_space<vmem>>, vector<1x8x16x128xf32>,
    return
  }
  func.func @transform_0(%arg0: i32) -> (i32, i32, i32, i32) {
    %c0_i32 = arith.constant 0 : i32
    %c0_i32_0 = arith.constant 0 : i32
    %c0_i32_1 = arith.constant 0 : i32
    %c0_i32_2 = arith.constant 0 : i32
    return %arg0, %c0_i32, %c0_i32_0, %c0_i32_1 : i32, i32, i32, i32
  }
  func.func @transform_1(%arg0: i32) -> (i32, i32) {
    %c0_i32 = arith.constant 0 : i32
    %c0_i32_0 = arith.constant 0 : i32
    %c0_i32_1 = arith.constant 0 : i32
    return %c0_i32, %c0_i32_0 : i32, i32
  }
  func.func @transform_2(%arg0: i32) -> (i32, i32) {
    %c0_i32 = arith.constant 0 : i32
    %c0_i32_0 = arith.constant 0 : i32
    %c0_i32_1 = arith.constant 0 : i32
    return %c0_i32, %c0_i32_0 : i32, i32
  }
  func.func @transform_3(%arg0: i32) -> (i32, i32) {
    %c0_i32 = arith.constant 0 : i32
    %c0_i32_0 = arith.constant 0 : i32
    %c0_i32_1 = arith.constant 0 : i32
    return %c0_i32, %c0_i32_0 : i32, i32
  }
  func.func @transform_4(%arg0: i32) -> (i32, i32) {
    %c0_i32 = arith.constant 0 : i32
    %c0_i32_0 = arith.constant 0 : i32
    %c0_i32_1 = arith.constant 0 : i32
    return %c0_i32, %c0_i32_0 : i32, i32
  }
  func.func @transform_5(%arg0: i32) -> (i32, i32, i32, i32) {
    %c0_i32 = arith.constant 0 : i32
    %c0_i32_0 = arith.constant 0 : i32
    %c0_i32_1 = arith.constant 0 : i32
    %c0_i32_2 = arith.constant 0 : i32
    return %arg0, %c0_i32, %c0_i32_0, %c0_i32_1 : i32, i32, i32, i32
  }
  func.func @transform_6(%arg0: i32) -> (i32, i32, i32, i32) {
    %c0_i32 = arith.constant 0 : i32
    %c0_i32_0 = arith.constant 0 : i32
    %c0_i32_1 = arith.constant 0 : i32
    %c0_i32_2 = arith.constant 0 : i32
    return %arg0, %c0_i32, %c0_i32_0, %c0_i32_1 : i32, i32, i32, i32
  }
}

</mosaic_0001>

<bundles_post_ra>
// kernel: tile.28
= control target key start
LH: loop header
LB: loop body
LE: loop exit
PB: predicated region body
PF: predicated region fallthrough
CT: control target
= control target key end

     0   :  { %s28_s0 = inlined_call_operand.vmem [shape: f32[8], index: 0, kind: input, shape index: {}]   ;;  %s29_s1 = inlined_call_operand.vmem [shape: f32[16,8], index: 1, kind: output, shape index: {}]  }
   0x1   :  { %v4_v0 = vld [vmem:[%s28_s0] ss:$0 sm:$0xff] }
   0x2   :  { %5 = vst [vmem:[%s29_s1] sm:$0xff] %v4_v0  ;;  %8 = vst [vmem:[%s29_s1 + $0x8] sm:$0xff] %v4_v0 }

// kernel: tile.29
= control target key start
LH: loop header
LB: loop body
LE: loop exit
PB: predicated region body
PF: predicated region fallthrough
CT: control target
= control target key end

     0   :  { %s131_s10 = smov 120   ;;  %s132_s11 = smov 104   ;;  %vm3_vm0 = vcmask 64512   ;;  %vm9_vm1 = vcmask 1048512   ;;  %vm15_vm2 = vcmask 982912   ;;  %vm21_vm3 = vcmask 917312   ;;  %s207_s0 = inlined_call_operand.vmem [shape: f32[16,8], index: 0, kind: input, shape index: {}]   ;;  %s208_s1 = inlined_call_operand.vmem [shape: f32[1,128], index: 1, kind: output, shape index: {}]  }
   0x1   :  { %v101_v0 = vld [vmem:[%s207_s0 + $0xf] sm:$0x1]   ;;  %v103_v1 = vld [vmem:[%s207_s0 + $0xd] sm:$0x1]   ;;  %v102_v2 = vld [vmem:[%s207_s0 + $0xe] sm:$0x1]  }
   0x2   :  { %7 = vrot.lane.b32.xlu0 %v101_v0, %s131_s10  ;;  %19 = vrot.lane.b32.xlu1 %v103_v1, %s132_s11  ;;  %v104_v3 = vld [vmem:[%s207_s0 + $0xc] sm:$0x1]   ;;  %s133_s16 = smov 112   ;;  %s134_s17 = smov 96   ;;  %v105_v4 = vld [vmem:[%s207_s0 + $0xb] sm:$0x1]  }
   0x3   :  { %v106_v5 = vld [vmem:[%s207_s0 + $0xa] sm:$0x1]   ;;  %v2_v6 = vld [vmem:[%s207_s0] sm:$0x1]   ;;  %s135_s24 = smov 88   ;;  %s136_s25 = smov 80  }
   0x4   :  { %4 = vst.msk [vmem:[#allocation0] sm:$0x1] %vm3_vm0, %v2_v6   ;;  %v107_v7 = vld [vmem:[%s207_s0 + $0x9] sm:$0x1]   ;;  %v108_v8 = vld [vmem:[%s207_s0 + $0x8] sm:$0x1]  }
   0x5   :  { %s137_s30 = smov 72   ;;  %s138_s2 = smov 64   ;;  %v109_v9 = vld [vmem:[%s207_s0 + $0x7] sm:$0x1]   ;;  %v110_v10 = vld [vmem:[%s207_s0 + $0x6] sm:$0x1]  }
   0x6   :  { %13 = vrot.lane.b32.xlu0 %v102_v2, %s133_s16  ;;  %25 = vrot.lane.b32.xlu1 %v104_v3, %s134_s17  ;;  %s139_s7 = smov 56   ;;  %s140_s8 = smov 48   ;;  %v111_v11 = vld [vmem:[%s207_s0 + $0x5] sm:$0x1]   ;;  %v112_v12 = vld [vmem:[%s207_s0 + $0x4] sm:$0x1]  }
   0x7   :  { %s141_s13 = smov 40   ;;  %s142_s14 = smov 32   ;;  %v113_v13 = vld [vmem:[%s207_s0 + $0x3] sm:$0x1]   ;;  %v114_v14 = vld [vmem:[%s207_s0 + $0x2] sm:$0x1]  }
   0x8   :  { %s143_s19 = smov 24   ;;  %s144_s20 = smov 16   ;;  %v115_v15 = vld [vmem:[%s207_s0 + $0x1] sm:$0x1]   ;;  %vm27_vm4 = vcmask 851712   ;;  %vm33_vm5 = vcmask 786112  }
   0x9   :  { %s145_s0 = smov 8   ;;  %vm39_vm6 = vcmask 720512   ;;  %vm45_vm7 = vcmask 654912   ;;  %vm51_vm8 = vcmask 589312   ;;  %vm57_vm9 = vcmask 523712  }
   0xa   :  { %31 = vrot.lane.b32.xlu0 %v105_v4, %s135_s24  ;;  %37 = vrot.lane.b32.xlu1 %v106_v5, %s136_s25  ;;  %vm63_vm10 = vcmask 458112   ;;  %vm69_vm11 = vcmask 392512   ;;  %vm75_vm12 = vcmask 326912   ;;  %vm81_vm13 = vcmask 261312  }
   0xb   :  { %vm87_vm14 = vcmask 195712   ;;  %vm93_vm15 = vcmask 130112  }
   0xe   :  { %43 = vrot.lane.b32.xlu0 %v107_v7, %s137_s30  ;;  %49 = vrot.lane.b32.xlu1 %v108_v8, %s138_s2 }
  0x12   :  { %55 = vrot.lane.b32.xlu0 %v109_v9, %s139_s7  ;;  %61 = vrot.lane.b32.xlu1 %v110_v10, %s140_s8 }
  0x16   :  { %67 = vrot.lane.b32.xlu0 %v111_v11, %s141_s13  ;;  %73 = vrot.lane.b32.xlu1 %v112_v12, %s142_s14 }
  0x1a   :  { %79 = vrot.lane.b32.xlu0 %v113_v13, %s143_s19  ;;  %85 = vrot.lane.b32.xlu1 %v114_v14, %s144_s20 }
  0x1e   :  { %91 = vrot.lane.b32.xlu0 %v115_v15, %s145_s0 }
  0x74   :  { %v8_v16 = vpop.permute.xlu0 %7   ;;  %v20_v17 = vpop.permute.xlu1 %19  }
  0x75   :  { %10 = vst.msk [vmem:[#allocation0] sm:$0x1] %vm9_vm1, %v8_v16  }
  0x78   :  { %v14_v18 = vpop.permute.xlu0 %13   ;;  %v26_v19 = vpop.permute.xlu1 %25  }
  0x79   :  { %16 = vst.msk [vmem:[#allocation0] sm:$0x1] %vm15_vm2, %v14_v18  }
  0x7a   :  { %22 = vst.msk [vmem:[#allocation0] sm:$0x1] %vm21_vm3, %v20_v17  }
  0x7b   :  { %28 = vst.msk [vmem:[#allocation0] sm:$0x1] %vm27_vm4, %v26_v19  }
  0x7c   :  { %v32_v20 = vpop.permute.xlu0 %31   ;;  %v38_v21 = vpop.permute.xlu1 %37  }
  0x7d   :  { %34 = vst.msk [vmem:[#allocation0] sm:$0x1] %vm33_vm5, %v32_v20  }
  0x7e   :  { %40 = vst.msk [vmem:[#allocation0] sm:$0x1] %vm39_vm6, %v38_v21  }
  0x80   :  { %v44_v22 = vpop.permute.xlu0 %43   ;;  %v50_v23 = vpop.permute.xlu1 %49  }
  0x81   :  { %46 = vst.msk [vmem:[#allocation0] sm:$0x1] %vm45_vm7, %v44_v22  }
  0x82   :  { %52 = vst.msk [vmem:[#allocation0] sm:$0x1] %vm51_vm8, %v50_v23  }
  0x84   :  { %v56_v24 = vpop.permute.xlu0 %55   ;;  %v62_v25 = vpop.permute.xlu1 %61  }
  0x85   :  { %58 = vst.msk [vmem:[#allocation0] sm:$0x1] %vm57_vm9, %v56_v24  }
  0x86   :  { %64 = vst.msk [vmem:[#allocation0] sm:$0x1] %vm63_vm10, %v62_v25  }
  0x88   :  { %v68_v26 = vpop.permute.xlu0 %67   ;;  %v74_v27 = vpop.permute.xlu1 %73  }
  0x89   :  { %70 = vst.msk [vmem:[#allocation0] sm:$0x1] %vm69_vm11, %v68_v26  }
  0x8a   :  { %76 = vst.msk [vmem:[#allocation0] sm:$0x1] %vm75_vm12, %v74_v27  }
  0x8c   :  { %v80_v28 = vpop.permute.xlu0 %79   ;;  %v86_v29 = vpop.permute.xlu1 %85  }
  0x8d   :  { %82 = vst.msk [vmem:[#allocation0] sm:$0x1] %vm81_vm13, %v80_v28  }
  0x8e   :  { %88 = vst.msk [vmem:[#allocation0] sm:$0x1] %vm87_vm14, %v86_v29  }
  0x90   :  { %v92_v30 = vpop.permute.xlu0 %91  }
  0x91   :  { %94 = vst.msk [vmem:[#allocation0] sm:$0x1] %vm93_vm15, %v92_v30  }
  0x98   :  { %v98_v31 = vld [vmem:[#allocation0] sm:$0x1] }
  0x99   :  { %100 = vst [vmem:[%s208_s1] sm:$0x1] %v98_v31 }

// kernel: resblock3d_forward.2
= control target key start
LH: loop header
LB: loop body
LE: loop exit
PB: predicated region body
PF: predicated region fallthrough
CT: control target
= control target key end

     0   :  { %s2476_s18 = smov 0   ;;  %s3108_s0 = inlined_call_operand.vmem [shape: f32[2,8,16,128], index: 0, kind: input, shape index: {}]   ;;  %s3109_s1 = inlined_call_operand.vmem [shape: bf16[1152,128], index: 1, kind: input, shape index: {}]   ;;  %s3110_s2 = inlined_call_operand.vmem [shape: f32[1,128], index: 2, kind: input, shape index: {}]   ;;  %s3111_s3 = inlined_call_operand.vmem [shape: f32[1,128], index: 3, kind: input, shape index: {}]   ;;  %s3112_s4 = inlined_call_operand.vmem [shape: bf16[2,8,16,128], index: 4, kind: output, shape index: {0}]   ;;  %s3113_s5 = inlined_call_operand.vmem [shape: f32[2,2,128], index: 5, kind: output, shape index: {1}]  }
   0x1 LB: > { %s1869_s19 = sadd.s32 4294967295, %s2443_s18   ;;  %p1873_p0 = scmp.ge.s32.totalorder %s2443_s18, 1  ;;  %s2443_s18 = sphi %s2476_s18, %s16_s18  }
   0x2   : > { %p190_p1 = scmp.lt.s32.totalorder %s2443_s18, 3 }
   0x4   : > { %p191_p2 = pnand %p1873_p0, %p190_p1 }
   0x5   : > { %v2365_v0 = vld [vmem:[%s3109_s1 + $0x40] sm:$0xff] (!%p191_p2)   ;;  %v2445_v2 = vmov (!%p191_p2), 0   ;;  %v2369_v6 = vld [vmem:[%s3109_s1 + $0x48] sm:$0xff] (!%p191_p2)   ;;  %v2373_v10 = vld [vmem:[%s3109_s1 + $0x50] sm:$0xff] (!%p191_p2)   ;;  %p222_p3 = scmp.lt.s32.totalorder (!%p191_p2), %s1869_s19, 1  ;;  %vm395_vm1 = vcmask (!%p191_p2), 1040384  }
   0x6   : > { %194 = sbr.rel (%p191_p2) target bundleno = 431 (0x1af), region = 36  ;;  %v2366_v1 = vld [vmem:[%s3109_s1 + $0xc0] sm:$0xff] (!%p191_p2)   ;;  %v2491_v3 = vrot.slane (!%p191_p2), %v2445_v2, 1  ;;  %2036 = vmatprep.subr.bf16.mxu0 (!%p191_p2), %v2365_v0  ;;  %v2370_v7 = vld [vmem:[%s3109_s1 + $0xc8] sm:$0xff] (!%p191_p2)   ;;  %v2374_v11 = vld [vmem:[%s3109_s1 + $0xd0] sm:$0xff] (!%p191_p2)   ;;  %vm530_vm3 = vcmask (!%p191_p2), 1046528  }
   0x7   : > { %v2367_v4 = vld [vmem:[%s3109_s1] sm:$0xff] (!%p191_p2)   ;;  %2100 = vmatprep.subr.bf16.mxu1 (!%p191_p2), %v2366_v1  ;;  %v2371_v8 = vld [vmem:[%s3109_s1 + $0x8] sm:$0xff] (!%p191_p2)   ;;  %v2375_v12 = vld [vmem:[%s3109_s1 + $0x10] sm:$0xff] (!%p191_p2)   ;;  %vm396_vm0 = vsmask.f32 (!%p191_p2), 256 }
   0x8   : > { %v2368_v5 = vld [vmem:[%s3109_s1 + $0x80] sm:$0xff] (!%p191_p2)   ;;  %1189 = vmatprep.mubr.bf16.mxu0 (!%p191_p2), %v2491_v3  ;;  %2037 = vmatpush3.bf16.msra.mxu0 (!%p191_p2), %v2367_v4  ;;  %v2372_v9 = vld [vmem:[%s3109_s1 + $0x88] sm:$0xff] (!%p191_p2)   ;;  %v2376_v13 = vld [vmem:[%s3109_s1 + $0x90] sm:$0xff] (!%p191_p2)   ;;  %vm414_vm2 = vsmask.f32 (!%p191_p2), 7424 }
   0x9   : > { %2101 = vmatpush3.bf16.msra.mxu1 (!%p191_p2), %v2368_v5  ;;  %2038 = vmatprep.subr.bf16.mxu0 (!%p191_p2), %v2369_v6  ;;  %v2377_v14 = vld [vmem:[%s3109_s1 + $0x58] sm:$0xff] (!%p191_p2)   ;;  %v2381_v18 = vld [vmem:[%s3109_s1 + $0x60] sm:$0xff] (!%p191_p2)   ;;  %v2385_v22 = vld [vmem:[%s3109_s1 + $0x68] sm:$0xff] (!%p191_p2)  }
   0xa   : > { %2102 = vmatprep.subr.bf16.mxu1 (!%p191_p2), %v2370_v7  ;;  %v2378_v15 = vld [vmem:[%s3109_s1 + $0xd8] sm:$0xff] (!%p191_p2)   ;;  %v2382_v19 = vld [vmem:[%s3109_s1 + $0xe0] sm:$0xff] (!%p191_p2)   ;;  %v2386_v23 = vld [vmem:[%s3109_s1 + $0xe8] sm:$0xff] (!%p191_p2)  }
   0xb   : > { %v2379_v16 = vld [vmem:[%s3109_s1 + $0x18] sm:$0xff] (!%p191_p2)   ;;  %v2383_v20 = vld [vmem:[%s3109_s1 + $0x20] sm:$0xff] (!%p191_p2)   ;;  %v2387_v24 = vld [vmem:[%s3109_s1 + $0x28] sm:$0xff] (!%p191_p2)  }
   0xc   : > { %2039 = vmatpush3.bf16.msra.mxu0 (!%p191_p2), %v2371_v8  ;;  %v2380_v17 = vld [vmem:[%s3109_s1 + $0x98] sm:$0xff] (!%p191_p2)   ;;  %v2384_v21 = vld [vmem:[%s3109_s1 + $0xa0] sm:$0xff] (!%p191_p2)   ;;  %v2388_v25 = vld [vmem:[%s3109_s1 + $0xa8] sm:$0xff] (!%p191_p2)  }
   0xd   : > { %2103 = vmatpush3.bf16.msra.mxu1 %v2372_v9  ;;  %2040 = vmatprep.subr.bf16.mxu0 %v2373_v10  ;;  %s3117_s19 = smov (!%p222_p3, %s1869_s19), 1  ;;  %v2389_v26 = vld [vmem:[%s3109_s1 + $0x70] sm:$0xff]   ;;  %v2393_v30 = vld [vmem:[%s3109_s1 + $0x78] sm:$0xff]   ;;  %v2599_v34 = vld [vmem:[%s3110_s2] ss:$0 sm:$0xff] }
   0xe   : > { %2104 = vmatprep.subr.bf16.mxu1 %v2374_v11  ;;  %v2390_v27 = vld [vmem:[%s3109_s1 + $0xf0] sm:$0xff]   ;;  %s1971_s28 = sshll.u32 %s3117_s19, 7  ;;  %v2394_v31 = vld [vmem:[%s3109_s1 + $0xf8] sm:$0xff]   ;;  %v2604_v35 = vld [vmem:[%s3111_s3] ss:$0 sm:$0xff]  ;;  %s1972_s10 = sshll.u32 %s3117_s19, 6 }
   0xf   : > { %v2391_v28 = vld [vmem:[%s3109_s1 + $0x30] sm:$0xff]   ;;  %s2588_s12 = scalar_lea.vmem %s3108_s0, %s1971_s28  ;;  %v2395_v32 = vld [vmem:[%s3109_s1 + $0x38] sm:$0xff]   ;;  %v2397_v39 = vld [vmem:[%s3109_s1 + $0x140] sm:$0xff]   ;;  %s3069_s14 = scalar_lea.vmem %s3112_s4, %s1972_s10 }
  0x10   : > { %2041 = vmatpush3.bf16.msra.mxu0 %v2375_v12  ;;  %v2392_v29 = vld [vmem:[%s3109_s1 + $0xb0] sm:$0xff]   ;;  %v2396_v33 = vld [vmem:[%s3109_s1 + $0xb8] sm:$0xff]   ;;  %v239_v36 = vld [vmem:[%s2588_s12] sm:$0xff]  ;;  %s1878_s15 = sshll.u32 %s3117_s19, 1 }
  0x11   : > { %2105 = vmatpush3.bf16.msra.mxu1 %v2376_v13  ;;  %2042 = vmatprep.subr.bf16.mxu0 %v2377_v14  ;;  %v240_v37 = vld [vmem:[%s2588_s12 + $0x8] sm:$0xff]  ;;  %v261_v38 = vmul.f32 %v2599_v34, %v239_v36  ;;  %v2398_v42 = vld [vmem:[%s3109_s1 + $0x100] sm:$0xff]   ;;  %v241_v43 = vld [vmem:[%s2588_s12 + $0x10] sm:$0xff]  ;;  %s235_s20 = scalar_lea.vmem %s3113_s5, %s1878_s15 }
  0x12   : > { %2106 = vmatprep.subr.bf16.mxu1 %v2378_v15  ;;  %v262_v40 = vmul.f32 %v2599_v34, %v240_v37  ;;  %v242_v45 = vld [vmem:[%s2588_s12 + $0x18] sm:$0xff]  ;;  %v263_v46 = vmul.f32 %v2599_v34, %v241_v43  ;;  %v2399_v49 = vld [vmem:[%s3109_s1 + $0x148] sm:$0xff]   ;;  %v243_v53 = vld [vmem:[%s2588_s12 + $0x20] sm:$0xff] }
  0x13   : > { %v283_v41 = vadd.f32 %v2604_v35, %v261_v38  ;;  %v264_v48 = vmul.f32 %v2599_v34, %v242_v45  ;;  %v2400_v52 = vld [vmem:[%s3109_s1 + $0x108] sm:$0xff]   ;;  %v265_v56 = vmul.f32 %v2599_v34, %v243_v53  ;;  %v2401_v58 = vld [vmem:[%s3109_s1 + $0x150] sm:$0xff]   ;;  %v2402_v61 = vld [vmem:[%s3109_s1 + $0x1c0] sm:$0xff]  }
  0x14   : > { %2043 = vmatpush3.bf16.msra.mxu0 %v2379_v16  ;;  %v284_v44 = vadd.f32 %v2604_v35, %v262_v40  ;;  %v285_v51 = vadd.f32 %v2604_v35, %v263_v46  ;;  %v244_v54 = vld [vmem:[%s2588_s12 + $0x28] sm:$0xff]  ;;  %v2403_v1 = vld [vmem:[%s3109_s1 + $0x110] sm:$0xff]   ;;  %v246_v10 = vld [vmem:[%s2588_s12 + $0x38] sm:$0xff] }
  0x15   : > { %2107 = vmatpush3.bf16.msra.mxu1 %v2380_v17  ;;  %2044 = vmatprep.subr.bf16.mxu0 %v2381_v18  ;;  %v299_v47 = vmax.f32 %v283_v41, 0.0  ;;  %v286_v55 = vadd.f32 %v2604_v35, %v264_v48  ;;  %v266_v57 = vmul.f32 %v2599_v34, %v244_v54  ;;  %v287_v63 = vadd.f32 %v2604_v35, %v265_v56  ;;  %v245_v9 = vld [vmem:[%s2588_s12 + $0x30] sm:$0xff]  ;;  %v2405_v14 = vld [vmem:[%s3109_s1 + $0x158] sm:$0xff]   ;;  %vm2655_vm4 = vmand %vm395_vm1, %vm396_vm0 }
  0x16   : > { %2108 = vmatprep.subr.bf16.mxu1 %v2382_v19  ;;  %v300_v50 = vmax.f32 %v284_v44, 0.0  ;;  %v301_v60 = vmax.f32 %v285_v51, 0.0  ;;  %v267_v12 = vmul.f32 %v2599_v34, %v245_v9  ;;  %v268_v13 = vmul.f32 %v2599_v34, %v246_v10  ;;  %v2408_v43 = vld [vmem:[%s3109_s1 + $0x188] sm:$0xff]   ;;  %v247_v51 = vld [vmem:[%s2588_s12 + $0x40] sm:$0xff]  ;;  %v2410_v53 = vld [vmem:[%s3109_s1 + $0x1d0] sm:$0xff]  }
  0x17   : > { %v302_v62 = vmax.f32 %v286_v55, 0.0  ;;  %v288_v0 = vadd.f32 %v2604_v35, %v266_v57  ;;  %v303_v7 = vmax.f32 %v287_v63, 0.0  ;;  %v248_v57 = vld [vmem:[%s2588_s12 + $0x48] sm:$0xff] }
  0x18   : > { %2045 = vmatpush3.bf16.msra.mxu0 %v2383_v20  ;;  %v315_v59 = vpack.c.bf16 %v300_v50, %v299_v47 }
  0x19   : > { %2109 = vmatpush3.bf16.msra.mxu1 %v2384_v21  ;;  %2046 = vmatprep.subr.bf16.mxu0 %v2385_v22  ;;  %v316_v6 = vpack.c.bf16 %v302_v62, %v301_v60  ;;  %v304_v8 = vmax.f32 %v288_v0, 0.0  ;;  %v289_v21 = vadd.f32 %v2604_v35, %v267_v12  ;;  %v290_v22 = vadd.f32 %v2604_v35, %v268_v13  ;;  %v249_v13 = vld [vmem:[%s2588_s12 + $0x50] sm:$0xff] }
  0x1a   : > { %2110 = vmatprep.subr.bf16.mxu1 %v2386_v23  ;;  %v324_v4 = vshrl.u32 %v315_v59, 16  ;;  %v327_v5 = vshll.u32 %v315_v59, 16  ;;  %v269_v12 = vmul.f32 %v2599_v34, %v247_v51 }
  0x1b   : > { %v331_v16 = vshrl.u32 %v316_v6, 16  ;;  %v334_v17 = vshll.u32 %v316_v6, 16  ;;  %v317_v18 = vpack.c.bf16 %v304_v8, %v303_v7  ;;  %v2412_v8 = vld [vmem:[%s3109_s1 + $0x190] sm:$0xff]  }
  0x1c   : > { %2047 = vmatpush3.bf16.msra.mxu0 %v2387_v24  ;;  %v326_v11 = vrot.slane %v324_v4, 7 }
  0x1d   : > { %2111 = vmatpush3.bf16.msra.mxu1 %v2388_v25  ;;  %2048 = vmatprep.subr.bf16.mxu0 %v2389_v26  ;;  %v333_v24 = vrot.slane %v331_v16, 7  ;;  %v338_v25 = vshrl.u32 %v317_v18, 16  ;;  %v2404_v26 = vld [vmem:[%s3109_s1 + $0x180] sm:$0xff]   ;;  %v2413_v16 = vld [vmem:[%s3109_s1 + $0x168] sm:$0xff]  }
  0x1e   : > { %2112 = vmatprep.subr.bf16.mxu1 %v2390_v27  ;;  %v329_v19 = vor.u32 %v327_v5, %v326_v11  ;;  %v406_v20 = vsel %vm2655_vm4, %v326_v11, 0  ;;  %v2406_v27 = vld [vmem:[%s3109_s1 + $0x1c8] sm:$0xff]  }
  0x1f   : > { %v431_v23 = vshll.u32 %v406_v20, 16  ;;  %v336_v37 = vor.u32 %v334_v17, %v333_v24  ;;  %v534_v38 = vrot.slane %v406_v20, 1  ;;  %v2677_v40 = vsel %vm2655_vm4, %v333_v24, 0 }
  0x20   : > { %2049 = vmatpush3.bf16.msra.mxu0 %v2391_v28  ;;  %v2407_v28 = vld [vmem:[%s3109_s1 + $0x118] sm:$0xff]   ;;  %v340_v41 = vrot.slane %v338_v25, 7  ;;  %v443_v47 = vshll.u32 %v2677_v40, 16  ;;  %v537_v10 = vrot.slane %v2677_v40, 1  ;;  %v270_v20 = vmul.f32 %v2599_v34, %v248_v57  ;;  %v2415_v25 = vld [vmem:[%s3109_s1 + $0x128] sm:$0xff]  }
  0x21   : > { %2113 = vmatpush3.bf16.msra.mxu1 %v2392_v29  ;;  %2050 = vmatprep.subr.bf16.mxu0 %v2393_v30  ;;  %v398_v29 = vsel %vm2655_vm4, 0, %v329_v19  ;;  %v341_v30 = vshll.u32 %v317_v18, 16  ;;  %v2684_v45 = vsel %vm2655_vm4, 0, %v336_v37  ;;  %v291_v24 = vadd.f32 %v2604_v35, %v269_v12 }
  0x22   : > { %2114 = vmatprep.subr.bf16.mxu1 %v2394_v31  ;;  %v305_v31 = vmax.f32 %v289_v21, 0.0  ;;  %1286 = vmatprep.mubr.bf16.mxu1 %v398_v29  ;;  %v426_v36 = vshll.u32 %v398_v29, 16  ;;  %v533_v46 = vrot.slane %v398_v29, 1  ;;  %v436_v48 = vshrl.u32 %v2684_v45, 16  ;;  %v2414_v21 = vld [vmem:[%s3109_s1 + $0x1d8] sm:$0xff]  }
  0x23   : > { %v343_v50 = vor.u32 %v341_v30, %v340_v41  ;;  %v445_v55 = vrot.slane %v443_v47, 1  ;;  %v2699_v56 = vsel %vm2655_vm4, %v340_v41, 0  ;;  %v536_v9 = vrot.slane %v2684_v45, 1  ;;  %v251_v41 = vld [vmem:[%s2588_s12 + $0x60] sm:$0xff] }
  0x24   : > { %2051 = vmatpush3.bf16.msra.mxu0 %v2395_v32  ;;  %v306_v32 = vmax.f32 %v290_v22, 0.0  ;;  %v428_v44 = vrot.slane %v426_v36, 1  ;;  %v2714_v0 = vsel %vm530_vm3, %v533_v46, %v534_v38  ;;  %v2416_v36 = vld [vmem:[%s3109_s1 + $0x198] sm:$0xff]   ;;  %v307_v38 = vmax.f32 %v291_v24, 0.0  ;;  %v252_v46 = vld [vmem:[%s2588_s12 + $0x68] sm:$0xff]  ;;  %v2424_v24 = vld [vmem:[%s3109_s1 + $0x1f0] sm:$0xff]  }
  0x25   : > { %2115 = vmatpush3.bf16.msra.mxu1 %v2396_v33  ;;  %2164 = vmatprep.subr.bf16.mxu0 %v2397_v39  ;;  %v424_v33 = vshrl.u32 %v398_v29, 16  ;;  %v433_v39 = vrot.slane %v431_v23, 1  ;;  %v2707_v60 = vsel %vm2655_vm4, 0, %v343_v50  ;;  %v2756_v30 = vsel %vm530_vm3, %v536_v9, %v537_v10  ;;  %v2422_v9 = vld [vmem:[%s3109_s1 + $0x1a8] sm:$0xff]   ;;  %v253_v10 = vld [vmem:[%s2588_s12 + $0x70] sm:$0xff] }
  0x26   : > { %2228 = vmatprep.subr.bf16.mxu1 %v2402_v61  ;;  %v455_v61 = vshll.u32 %v2699_v56, 16  ;;  %v450_v4 = vshll.u32 %v2707_v60, 16  ;;  %v273_v47 = vmul.f32 %v2599_v34, %v251_v41  ;;  %v274_v51 = vmul.f32 %v2599_v34, %v252_v46 }
  0x27   : > { %1190 = vmatmul.mubr.bf16.vlgmr.msra.gmra.mrb[0].mxu0 %v2445_v2  ;;  %v429_v54 = vor.u32 %v428_v44, %v424_v33 }
  0x28   : > { %2165 = vmatpush3.bf16.msra.mxu0 %v2398_v42  ;;  %1287 = vmatmul.mubr.bf16.vlgmr.msra.gmra.mrb[0].mxu1 %v2491_v3  ;;  %v318_v42 = vpack.c.bf16 %v306_v32, %v305_v31  ;;  %v452_v11 = vrot.slane %v450_v4, 1  ;;  %v457_v23 = vrot.slane %v455_v61, 1  ;;  %v539_v31 = vrot.slane %v2707_v60, 1  ;;  %v2419_v61 = vld [vmem:[%s3109_s1 + $0x130] sm:$0xff]   ;;  %v2420_v4 = vld [vmem:[%s3109_s1 + $0x1a0] sm:$0xff]  }
  0x29   : > { %2166 = vmatprep.subr.bf16.mxu0 %v2399_v49  ;;  %2229 = vmatpush3.bf16.msra.mxu1 %v2404_v26  ;;  %v438_v49 = vshll.u32 %v2684_v45, 16  ;;  %v2711_v63 = vsel %vm414_vm2, %v429_v54, %v433_v39  ;;  %v540_v32 = vrot.slane %v2699_v56, 1  ;;  %v295_v54 = vadd.f32 %v2604_v35, %v273_v47 }
  0x2a   : > { %1294 = vmatprep.mubr.bf16.mxu1 %v2684_v45  ;;  %2230 = vmatprep.subr.bf16.mxu1 %v2406_v27  ;;  %v345_v62 = vshrl.u32 %v318_v42, 16  ;;  %v348_v7 = vshll.u32 %v318_v42, 16 }
  0x2b   : > { %v440_v59 = vrot.slane %v438_v49, 1  ;;  %1197 = vmatprep.mubr.bf16.mxu0 %v2711_v63 }
  0x2c   : > { %2167 = vmatpush3.bf16.msra.mxu0 %v2400_v52  ;;  %v2409_v52 = vld [vmem:[%s3109_s1 + $0x160] sm:$0xff]   ;;  %v347_v6 = vrot.slane %v345_v62, 7 }
  0x2d   : > { %2168 = vmatprep.subr.bf16.mxu0 %v2401_v58  ;;  %v2411_v58 = vld [vmem:[%s3109_s1 + $0x120] sm:$0xff]   ;;  %2231 = vmatpush3.bf16.msra.mxu1 %v2408_v43  ;;  %v441_v5 = vor.u32 %v440_v59, %v436_v48  ;;  %v296_v59 = vadd.f32 %v2604_v35, %v274_v51  ;;  %v2427_v51 = vld [vmem:[%s3109_s1 + $0x1f8] sm:$0xff]  }
  0x2e   : > { %2232 = vmatprep.subr.bf16.mxu1 %v2410_v53  ;;  %v350_v18 = vor.u32 %v348_v7, %v347_v6  ;;  %v2736_v19 = vsel %vm2655_vm4, %v347_v6, 0 }
  0x2f   : > { %1198 = vmatmul.mubr.bf16.gmra.mrb[4].mxu0 %v398_v29  ;;  %v2732_v17 = vsel %vm414_vm2, %v441_v5, %v445_v55  ;;  %v467_v27 = vshll.u32 %v2736_v19, 16  ;;  %v271_v29 = vmul.f32 %v2599_v34, %v249_v13  ;;  %v2418_v55 = vld [vmem:[%s3109_s1 + $0x1e0] sm:$0xff]   ;;  %v312_v7 = vmax.f32 %v296_v59, 0.0 }
  0x30   : > { %2169 = vmatpush3.bf16.msra.mxu0 %v2403_v1  ;;  %v448_v1 = vshrl.u32 %v2707_v60, 16  ;;  %1295 = vmatmul.mubr.bf16.gmra.mrb[4].mxu1 %v2714_v0  ;;  %v2750_v26 = vsel %vm2655_vm4, 0, %v350_v18  ;;  %v2806_v18 = vsel %vm530_vm3, %v539_v31, %v540_v32  ;;  %v543_v31 = vrot.slane %v2736_v19, 1 }
  0x31   : > { %2170 = vmatprep.subr.bf16.mxu0 %v2405_v14  ;;  %v250_v14 = vld [vmem:[%s2588_s12 + $0x58] sm:$0xff]  ;;  %1205 = vmatprep.mubr.bf16.mxu0 %v2732_v17  ;;  %v462_v33 = vshll.u32 %v2750_v26, 16  ;;  %v460_v37 = vshrl.u32 %v2750_v26, 16  ;;  %v293_v44 = vadd.f32 %v2604_v35, %v271_v29  ;;  %v469_v48 = vrot.slane %v467_v27, 1 }
  0x32   : > { %1302 = vmatprep.mubr.bf16.mxu1 %v2707_v60  ;;  %v453_v22 = vor.u32 %v452_v11, %v448_v1  ;;  %2233 = vmatpush3.bf16.msra.mxu1 %v2412_v8  ;;  %v272_v40 = vmul.f32 %v2599_v34, %v250_v14  ;;  %v311_v1 = vmax.f32 %v295_v54, 0.0  ;;  %v2421_v8 = vld [vmem:[%s3109_s1 + $0x1e8] sm:$0xff]  }
  0x33   : > { %2234 = vmatprep.subr.bf16.mxu1 %v2414_v21  ;;  %v464_v43 = vrot.slane %v462_v33, 1  ;;  %v309_v53 = vmax.f32 %v293_v44, 0.0 }
  0x34   : > { %2171 = vmatpush3.bf16.msra.mxu0 %v2407_v28  ;;  %v292_v28 = vadd.f32 %v2604_v35, %v270_v20  ;;  %v2768_v42 = vsel %vm414_vm2, %v453_v22, %v457_v23  ;;  %v294_v50 = vadd.f32 %v2604_v35, %v272_v40  ;;  %v321_v22 = vpack.c.bf16 %v312_v7, %v311_v1  ;;  %v2423_v23 = vld [vmem:[%s3109_s1 + $0x178] sm:$0xff]  }
  0x35   : > { %2172 = vmatprep.subr.bf16.mxu0 %v2409_v52  ;;  %v2417_v52 = vld [vmem:[%s3109_s1 + $0x170] sm:$0xff]   ;;  %v465_v62 = vor.u32 %v464_v43, %v460_v37 }
  0x36   : > { %v308_v39 = vmax.f32 %v292_v28, 0.0  ;;  %2235 = vmatpush3.bf16.msra.mxu1 %v2416_v36  ;;  %v275_v28 = vmul.f32 %v2599_v34, %v253_v10  ;;  %v542_v36 = vrot.slane %v2750_v26, 1  ;;  %v2426_v43 = vld [vmem:[%s3109_s1 + $0x1b0] sm:$0xff]  }
  0x37   : > { %1206 = vmatmul.mubr.bf16.gmra.mrb[8].mxu0 %v2684_v45  ;;  %2236 = vmatprep.subr.bf16.mxu1 %v2418_v55  ;;  %v2809_v20 = vsel %vm414_vm2, %v465_v62, %v469_v48 }
  0x38   : > { %2173 = vmatpush3.bf16.msra.mxu0 %v2411_v58  ;;  %v319_v49 = vpack.c.bf16 %v308_v39, %v307_v38  ;;  %1303 = vmatmul.mubr.bf16.gmra.mrb[8].mxu1 %v2756_v30  ;;  %v310_v58 = vmax.f32 %v294_v50, 0.0  ;;  %v366_v38 = vshrl.u32 %v321_v22, 16  ;;  %v369_v39 = vshll.u32 %v321_v22, 16 }
  0x39   : > { %2174 = vmatprep.subr.bf16.mxu0 %v2413_v16  ;;  %1213 = vmatprep.mubr.bf16.mxu0 %v2768_v42  ;;  %v254_v16 = vld [vmem:[%s2588_s12 + $0x78] sm:$0xff]  ;;  %v297_v47 = vadd.f32 %v2604_v35, %v275_v28 }
  0x3a   : > { %v352_v56 = vshrl.u32 %v319_v49, 16  ;;  %v355_v57 = vshll.u32 %v319_v49, 16  ;;  %1310 = vmatprep.mubr.bf16.mxu1 %v2750_v26  ;;  %v320_v6 = vpack.c.bf16 %v310_v58, %v309_v53  ;;  %2237 = vmatpush3.bf16.msra.mxu1 %v2420_v4  ;;  %v276_v29 = vmul.f32 %v2599_v34, %v254_v16  ;;  %v2425_v34 = vld [vmem:[%s3109_s1 + $0x138] sm:$0xff]  }
  0x3b   : > { %2238 = vmatprep.subr.bf16.mxu1 %v2421_v8  ;;  %v368_v46 = vrot.slane %v366_v38, 7  ;;  %v313_v55 = vmax.f32 %v297_v47, 0.0 }
  0x3c   : > { %2175 = vmatpush3.bf16.msra.mxu0 %v2415_v25  ;;  %v354_v5 = vrot.slane %v352_v56, 7  ;;  %v359_v13 = vshrl.u32 %v320_v6, 16  ;;  %v362_v14 = vshll.u32 %v320_v6, 16  ;;  %v298_v48 = vadd.f32 %v2604_v35, %v276_v29  ;;  %v2428_v35 = vld [vmem:[%s3109_s1 + $0x1b8] sm:$0xff]  }
  0x3d   : > { %2176 = vmatprep.subr.bf16.mxu0 %v2417_v52  ;;  %v2853_v52 = vsel %vm530_vm3, %v542_v36, %v543_v31  ;;  %v371_v54 = vor.u32 %v369_v39, %v368_v46  ;;  %v412_v8 = vsel %vm2655_vm4, %v368_v46, 0 }
  0x3e   : > { %v357_v11 = vor.u32 %v355_v57, %v354_v5  ;;  %v2802_v12 = vsel %vm2655_vm4, %v354_v5, 0  ;;  %v361_v27 = vrot.slane %v359_v13, 7  ;;  %2239 = vmatpush3.bf16.msra.mxu1 %v2422_v9  ;;  %v314_v59 = vmax.f32 %v298_v48, 0.0 }
  0x3f   : > { %v479_v21 = vshll.u32 %v2802_v12, 16  ;;  %1214 = vmatmul.mubr.bf16.gmra.mrb[12].mxu0 %v2707_v60  ;;  %2240 = vmatprep.subr.bf16.mxu1 %v2424_v24  ;;  %v2870_v62 = vsel %vm2655_vm4, 0, %v371_v54  ;;  %v546_v1 = vrot.slane %v2802_v12, 1  ;;  %v503_v12 = vshll.u32 %v412_v8, 16 }
  0x40   : > { %2177 = vmatpush3.bf16.msra.mxu0 %v2419_v61  ;;  %v2820_v25 = vsel %vm2655_vm4, 0, %v357_v11  ;;  %1311 = vmatmul.mubr.bf16.gmra.mrb[12].mxu1 %v2806_v18  ;;  %v364_v37 = vor.u32 %v362_v14, %v361_v27  ;;  %v2837_v41 = vsel %vm2655_vm4, %v361_v27, 0  ;;  %v2866_v61 = vld [vmem:[%s3109_s1 + $0x200] sm:$0xff]   ;;  %v322_v6 = vpack.c.bf16 %v314_v59, %v313_v55 }
  0x41   : > { %v472_v32 = vshrl.u32 %v2820_v25, 16  ;;  %v474_v33 = vshll.u32 %v2820_v25, 16  ;;  %1221 = vmatprep.mubr.bf16.mxu0 %v2809_v20  ;;  %1318 = vmatprep.mubr.bf16.mxu1 %v2820_v25  ;;  %v481_v40 = vrot.slane %v479_v21, 1  ;;  %v491_v53 = vshll.u32 %v2837_v41, 16 }
  0x42   : > { %2178 = vmatprep.subr.bf16.mxu0 %v2423_v23  ;;  %v2844_v44 = vsel %vm2655_vm4, 0, %v364_v37  ;;  %2241 = vmatpush3.bf16.msra.mxu1 %v2426_v43  ;;  %v545_v4 = vrot.slane %v2820_v25, 1  ;;  %v498_v9 = vshll.u32 %v2870_v62, 16  ;;  %v373_v10 = vshrl.u32 %v322_v6, 16 }
  0x43   : > { %v476_v19 = vrot.slane %v474_v33, 1  ;;  %v486_v50 = vshll.u32 %v2844_v44, 16  ;;  %v484_v57 = vshrl.u32 %v2844_v44, 16  ;;  %2242 = vmatprep.subr.bf16.mxu1 %v2427_v51  ;;  %v493_v5 = vrot.slane %v491_v53, 1 }
  0x44   : > { %2179 = vmatpush3.bf16.msra.mxu0 %v2425_v34  ;;  %v376_v11 = vshll.u32 %v322_v6, 16  ;;  %v375_v13 = vrot.slane %v373_v10, 7  ;;  %v2884_v14 = vsel %vm530_vm3, %v545_v4, %v546_v1  ;;  %v496_v21 = vshrl.u32 %v2870_v62, 16 }
  0x45   : > { %v477_v49 = vor.u32 %v476_v19, %v472_v32  ;;  %v488_v58 = vrot.slane %v486_v50, 1  ;;  %2308 = vmatprep.subr.bf16.mxu0 %v2866_v61  ;;  %v500_v22 = vrot.slane %v498_v9, 1  ;;  %v548_v29 = vrot.slane %v2844_v44, 1  ;;  %v2430_v50 = vld [vmem:[%s3109_s1 + $0x208] sm:$0xff]  }
  0x46   : > { %2243 = vmatpush3.bf16.msra.mxu1 %v2428_v35  ;;  %v378_v23 = vor.u32 %v376_v11, %v375_v13  ;;  %v413_v24 = vsel %vm2655_vm4, %v375_v13, 0  ;;  %v549_v31 = vrot.slane %v2837_v41, 1  ;;  %v505_v32 = vrot.slane %v503_v12, 1 }
  0x47   : > { %v2860_v56 = vsel %vm414_vm2, %v477_v49, %v481_v40  ;;  %1222 = vmatmul.mubr.bf16.gmra.mrb[16].mxu0 %v2750_v26  ;;  %v489_v7 = vor.u32 %v488_v58, %v484_v57  ;;  %2340 = vmatprep.subr.bf16.mxu1 %v2866_v61  ;;  %v570_v27 = vshll.u32 %v413_v24, 16  ;;  %v578_v28 = vrot.slane %v413_v24, 1 }
  0x48   : > { %1319 = vmatmul.mubr.bf16.gmra.mrb[16].mxu1 %v2853_v52  ;;  %1229 = vmatprep.mubr.bf16.mxu0 %v2860_v56  ;;  %v2899_v33 = vsel %vm2655_vm4, 0, %v378_v23  ;;  %v501_v36 = vor.u32 %v500_v22, %v496_v21  ;;  %v2909_v41 = vsel %vm530_vm3, %v548_v29, %v549_v31  ;;  %v551_v47 = vrot.slane %v2870_v62, 1 }
  0x49   : > { %1326 = vmatprep.mubr.bf16.mxu1 %v2844_v44  ;;  %v2887_v16 = vsel %vm414_vm2, %v489_v7, %v493_v5  ;;  %v563_v37 = vshrl.u32 %v2899_v33, 16  ;;  %v565_v38 = vshll.u32 %v2899_v33, 16  ;;  %v577_v39 = vrot.slane %v2899_v33, 1 }
  0x4a   : > { %v572_v19 = vrot.slane %v570_v27, 1  ;;  %v2912_v15 = vsel %vm414_vm2, %v501_v36, %v505_v32  ;;  %v552_v48 = vrot.slane %v412_v8, 1 }
  0x4b   : > { %v567_v34 = vrot.slane %v565_v38, 1  ;;  %v2906_v40 = vsel %vm530_vm3, %v577_v39, %v578_v28 }
  0x4c   : > { %v2923_v49 = vsel %vm530_vm3, %v551_v47, %v552_v48 }
  0x4d   : > { %v568_v43 = vor.u32 %v567_v34, %v563_v37 }
  0x4f   : > { %1230 = vmatmul.mubr.bf16.gmra.mrb[20].mxu0 %v2820_v25  ;;  %v2916_v46 = vsel %vm414_vm2, %v568_v43, %v572_v19 }
  0x50   : > { %1327 = vmatmul.mubr.bf16.gmra.mrb[20].mxu1 %v2884_v14  ;;  %1237 = vmatprep.mubr.bf16.mxu0 %v2887_v16 }
  0x51   : > { %1334 = vmatprep.mubr.bf16.mxu1 %v2870_v62 }
  0x57   : > { %1238 = vmatmul.mubr.bf16.gmra.mrb[24].mxu0 %v2844_v44 }
  0x58   : > { %1335 = vmatmul.mubr.bf16.gmra.mrb[24].mxu1 %v2909_v41  ;;  %1245 = vmatprep.mubr.bf16.mxu0 %v2912_v15 }
  0x59   : > { %1342 = vmatprep.mubr.bf16.mxu1 %v2899_v33 }
  0x5f   : > { %1246 = vmatmul.mubr.bf16.gmra.mrb[28].mxu0 %v2870_v62 }
  0x60   : > { %1343 = vmatmul.mubr.bf16.gmra.mrb[28].mxu1 %v2923_v49  ;;  %1383 = vmatprep.mubr.bf16.mxu0 %v2714_v0  ;;  %v2431_v0 = vld [vmem:[%s3109_s1 + $0x210] sm:$0xff]  }
  0x61   : > { %1480 = vmatprep.mubr.bf16.mxu1 %v2732_v17 }
  0x67   : > { %1384 = vmatmul.mubr.bf16.vlgmr.msra.gmra.mrb[32].mxu0 %v2711_v63  ;;  %v2433_v63 = vld [vmem:[%s3109_s1 + $0x220] sm:$0xff]  }
  0x68   : > { %1481 = vmatmul.mubr.bf16.vlgmr.msra.gmra.mrb[32].mxu1 %v2684_v45  ;;  %2309 = vmatpush3.bf16.msra.mxu0 %v2866_v61  ;;  %v2432_v45 = vld [vmem:[%s3109_s1 + $0x218] sm:$0xff]  }
  0x69   : > { %1391 = vmatprep.mubr.bf16.mxu0 %v2756_v30  ;;  %1488 = vmatprep.mubr.bf16.mxu1 %v2768_v42 }
  0x6a   : > { %2310 = vmatprep.subr.bf16.mxu0 %v2430_v50  ;;  %2348 = vmatpush3.bf16.msra.mxu1 %v2866_v61 }
  0x6b   : > { %2341 = vmatprep.subr.bf16.mxu1 %v2430_v50 }
  0x6c   : > { %2311 = vmatpush3.bf16.msra.mxu0 %v2430_v50 }
  0x6d   : > { %2312 = vmatprep.subr.bf16.mxu0 %v2431_v0 }
  0x6e   : > { %2349 = vmatpush3.bf16.msra.mxu1 %v2430_v50 }
  0x6f   : > { %1392 = vmatmul.mubr.bf16.gmra.mrb[36].mxu0 %v2732_v17  ;;  %2342 = vmatprep.subr.bf16.mxu1 %v2431_v0  ;;  %v2434_v17 = vld [vmem:[%s3109_s1 + $0x228] sm:$0xff]  }
  0x70   : > { %1489 = vmatmul.mubr.bf16.gmra.mrb[36].mxu1 %v2707_v60  ;;  %1399 = vmatprep.mubr.bf16.mxu0 %v2806_v18  ;;  %v2435_v60 = vld [vmem:[%s3109_s1 + $0x230] sm:$0xff]  }
  0x71   : > { %1496 = vmatprep.mubr.bf16.mxu1 %v2809_v20  ;;  %2313 = vmatpush3.bf16.msra.mxu0 %v2431_v0 }
  0x72   : > { %2314 = vmatprep.subr.bf16.mxu0 %v2432_v45  ;;  %2350 = vmatpush3.bf16.msra.mxu1 %v2431_v0 }
  0x73   : > { %2343 = vmatprep.subr.bf16.mxu1 %v2432_v45 }
  0x75   : > { %2315 = vmatpush3.bf16.msra.mxu0 %v2432_v45 }
  0x76   : > { %2316 = vmatprep.subr.bf16.mxu0 %v2433_v63  ;;  %2351 = vmatpush3.bf16.msra.mxu1 %v2432_v45 }
  0x77   : > { %1400 = vmatmul.mubr.bf16.gmra.mrb[40].mxu0 %v2768_v42  ;;  %2344 = vmatprep.subr.bf16.mxu1 %v2433_v63  ;;  %v2436_v42 = vld [vmem:[%s3109_s1 + $0x238] sm:$0xff]  }
  0x78   : > { %1497 = vmatmul.mubr.bf16.gmra.mrb[40].mxu1 %v2750_v26  ;;  %1407 = vmatprep.mubr.bf16.mxu0 %v2853_v52 }
  0x79   : > { %1504 = vmatprep.mubr.bf16.mxu1 %v2860_v56  ;;  %2317 = vmatpush3.bf16.msra.mxu0 %v2433_v63 }
  0x7a   : > { %2318 = vmatprep.subr.bf16.mxu0 %v2434_v17  ;;  %2352 = vmatpush3.bf16.msra.mxu1 %v2433_v63 }
  0x7b   : > { %2345 = vmatprep.subr.bf16.mxu1 %v2434_v17 }
  0x7d   : > { %2319 = vmatpush3.bf16.msra.mxu0 %v2434_v17 }
  0x7e   : > { %2320 = vmatprep.subr.bf16.mxu0 %v2435_v60  ;;  %2353 = vmatpush3.bf16.msra.mxu1 %v2434_v17 }
  0x7f   : > { %1408 = vmatmul.mubr.bf16.gmra.mrb[44].mxu0 %v2809_v20  ;;  %2346 = vmatprep.subr.bf16.mxu1 %v2435_v60 }
  0x80   : > { %1505 = vmatmul.mubr.bf16.gmra.mrb[44].mxu1 %v2820_v25  ;;  %1415 = vmatprep.mubr.bf16.mxu0 %v2884_v14 }
  0x81   : > { %1512 = vmatprep.mubr.bf16.mxu1 %v2887_v16  ;;  %2321 = vmatpush3.bf16.msra.mxu0 %v2435_v60 }
  0x82   : > { %2322 = vmatprep.subr.bf16.mxu0 %v2436_v42  ;;  %2354 = vmatpush3.bf16.msra.mxu1 %v2435_v60 }
  0x83   : > { %2347 = vmatprep.subr.bf16.mxu1 %v2436_v42 }
  0x85   : > { %2323 = vmatpush3.bf16.msra.mxu0 %v2436_v42 }
  0x86   : > { %2355 = vmatpush3.bf16.msra.mxu1 %v2436_v42 }
  0x87   : > { %1416 = vmatmul.mubr.bf16.gmra.mrb[48].mxu0 %v2860_v56 }
  0x88   : > { %1513 = vmatmul.mubr.bf16.gmra.mrb[48].mxu1 %v2844_v44  ;;  %1423 = vmatprep.mubr.bf16.mxu0 %v2909_v41 }
  0x89   : > { %1520 = vmatprep.mubr.bf16.mxu1 %v2912_v15 }
  0x8f   : > { %1424 = vmatmul.mubr.bf16.gmra.mrb[52].mxu0 %v2887_v16 }
  0x90   : > { %1521 = vmatmul.mubr.bf16.gmra.mrb[52].mxu1 %v2870_v62  ;;  %1431 = vmatprep.mubr.bf16.mxu0 %v2923_v49 }
  0x91   : > { %1528 = vmatprep.mubr.bf16.mxu1 %v2916_v46 }
  0x97   : > { %1432 = vmatmul.mubr.bf16.gmra.mrb[56].mxu0 %v2912_v15 }
  0x98   : > { %1529 = vmatmul.mubr.bf16.gmra.mrb[56].mxu1 %v2899_v33  ;;  %1439 = vmatprep.mubr.bf16.mxu0 %v2906_v40 }
  0x99   : > { %1536 = vmatprep.mubr.bf16.mxu1 %v2491_v3 }
  0x9f   : > { %1440 = vmatmul.mubr.bf16.gmra.mrb[60].mxu0 %v2916_v46 }
  0xa0   : > { %1537 = vmatmul.mubr.bf16.gmra.mrb[60].mxu1 %v2445_v2  ;;  %2324 = vmatprep.mubr.bf16.mxu0 %v2756_v30 }
  0xa1   : > { %2332 = vmatprep.mubr.bf16.mxu1 %v2909_v41 }
  0xa7   : > { %2325 = vmatmul.mubr.bf16.vlgmr.msra.gmra.mrb[64].mxu0 %v2806_v18 }
  0xa8   : > { %2333 = vmatmul.mubr.bf16.vlgmr.msra.gmra.mrb[64].mxu1 %v2923_v49  ;;  %2328 = vmatprep.mubr.bf16.mxu0 %v2853_v52 }
  0xa9   : > { %2336 = vmatprep.mubr.bf16.mxu1 %v2906_v40 }
  0xaf   : > { %2329 = vmatmul.mubr.bf16.gmra.mrb[68].mxu0 %v2884_v14 }
  0xb0   : > { %2337 = vmatmul.mubr.bf16.gmra.mrb[68].mxu1 %v2491_v3 }
  0xfa   : > { %v2052_v26 = vpop.f32.mrb[0].mxu0 }
  0xfb   : > { %v2053_v20 = vpop.f32.mrb[1].mxu0  ;;  %v2116_v51 = vpop.f32.mrb[0].mxu1 }
  0xfc   : > { %v2054_v25 = vadd.f32 %v2053_v20, %v2052_v26  ;;  %v2055_v2 = vpop.f32.mrb[2].mxu0  ;;  %v2117_v53 = vpop.f32.mrb[1].mxu1 }
  0xfd   : > { %v2056_v44 = vpop.f32.mrb[3].mxu0  ;;  %v2118_v54 = vadd.f32 %v2117_v53, %v2116_v51  ;;  %v2119_v18 = vpop.f32.mrb[2].mxu1 }
  0xfe   : > { %v2057_v30 = vadd.f32 %v2056_v44, %v2055_v2  ;;  %v2120_v55 = vpop.f32.mrb[3].mxu1 }
  0xff   : > { %v2990_v35 = vadd.f32 %v2118_v54, %v2054_v25  ;;  %v2121_v52 = vadd.f32 %v2120_v55, %v2119_v18 }
 0x101   : > { %v2992_v56 = vadd.f32 %v2121_v52, %v2057_v30 }
 0x102   : > { %v2058_v57 = vpop.f32.mrb[4].mxu0 }
 0x103   : > { %v2122_v58 = vpop.f32.mrb[4].mxu1  ;;  %v2059_v59 = vpop.f32.mrb[5].mxu0 }
 0x104   : > { %v2060_v3 = vadd.f32 %v2059_v59, %v2058_v57  ;;  %v2123_v61 = vpop.f32.mrb[5].mxu1  ;;  %v2061_v62 = vpop.f32.mrb[6].mxu0 }
 0x105   : > { %v2124_v1 = vadd.f32 %v2123_v61, %v2122_v58  ;;  %v2125_v4 = vpop.f32.mrb[6].mxu1  ;;  %v2062_v5 = vpop.f32.mrb[7].mxu0 }
 0x106   : > { %v2063_v6 = vadd.f32 %v2062_v5, %v2061_v62  ;;  %v2126_v7 = vpop.f32.mrb[7].mxu1 }
 0x107   : > { %v2994_v8 = vadd.f32 %v2124_v1, %v2060_v3  ;;  %v2127_v9 = vadd.f32 %v2126_v7, %v2125_v4 }
 0x109   : > { %v2996_v10 = vadd.f32 %v2127_v9, %v2063_v6 }
 0x10a   : > { %v2064_v11 = vpop.f32.mrb[8].mxu0 }
 0x10b   : > { %v2128_v12 = vpop.f32.mrb[8].mxu1  ;;  %v2065_v13 = vpop.f32.mrb[9].mxu0 }
 0x10c   : > { %v2066_v14 = vadd.f32 %v2065_v13, %v2064_v11  ;;  %v2129_v16 = vpop.f32.mrb[9].mxu1  ;;  %v2067_v21 = vpop.f32.mrb[10].mxu0 }
 0x10d   : > { %v2130_v22 = vadd.f32 %v2129_v16, %v2128_v12  ;;  %v2131_v23 = vpop.f32.mrb[10].mxu1  ;;  %v2068_v24 = vpop.f32.mrb[11].mxu0 }
 0x10e   : > { %v2069_v27 = vadd.f32 %v2068_v24, %v2067_v21  ;;  %v2132_v28 = vpop.f32.mrb[11].mxu1 }
 0x10f   : > { %v2998_v29 = vadd.f32 %v2130_v22, %v2066_v14  ;;  %v2133_v31 = vadd.f32 %v2132_v28, %v2131_v23 }
 0x111   : > { %v3000_v32 = vadd.f32 %v2133_v31, %v2069_v27 }
 0x112   : > { %v2070_v33 = vpop.f32.mrb[12].mxu0 }
 0x113   : > { %v2134_v36 = vpop.f32.mrb[12].mxu1  ;;  %v2071_v37 = vpop.f32.mrb[13].mxu0 }
 0x114   : > { %v2072_v38 = vadd.f32 %v2071_v37, %v2070_v33  ;;  %v2135_v39 = vpop.f32.mrb[13].mxu1  ;;  %v2073_v34 = vpop.f32.mrb[14].mxu0 }
 0x115   : > { %v2136_v19 = vadd.f32 %v2135_v39, %v2134_v36  ;;  %v2137_v40 = vpop.f32.mrb[14].mxu1  ;;  %v2074_v41 = vpop.f32.mrb[15].mxu0 }
 0x116   : > { %v2075_v15 = vadd.f32 %v2074_v41, %v2073_v34  ;;  %v2138_v43 = vpop.f32.mrb[15].mxu1 }
 0x117   : > { %v3002_v46 = vadd.f32 %v2136_v19, %v2072_v38  ;;  %v2139_v47 = vadd.f32 %v2138_v43, %v2137_v40 }
 0x119   : > { %v3004_v48 = vadd.f32 %v2139_v47, %v2075_v15 }
 0x11a   : > { %v2076_v49 = vpop.f32.mrb[16].mxu0 }
 0x11b   : > { %v2140_v50 = vpop.f32.mrb[16].mxu1  ;;  %v2077_v0 = vpop.f32.mrb[17].mxu0 }
 0x11c   : > { %v2078_v45 = vadd.f32 %v2077_v0, %v2076_v49  ;;  %v2141_v63 = vpop.f32.mrb[17].mxu1  ;;  %v2079_v17 = vpop.f32.mrb[18].mxu0 }
 0x11d   : > { %v2142_v60 = vadd.f32 %v2141_v63, %v2140_v50  ;;  %v2143_v42 = vpop.f32.mrb[18].mxu1  ;;  %v2080_v26 = vpop.f32.mrb[19].mxu0 }
 0x11e   : > { %v2081_v20 = vadd.f32 %v2080_v26, %v2079_v17  ;;  %v2144_v25 = vpop.f32.mrb[19].mxu1 }
 0x11f   : > { %v3006_v2 = vadd.f32 %v2142_v60, %v2078_v45  ;;  %v2145_v44 = vadd.f32 %v2144_v25, %v2143_v42 }
 0x121   : > { %v3008_v30 = vadd.f32 %v2145_v44, %v2081_v20 }
 0x122   : > { %v2082_v51 = vpop.f32.mrb[20].mxu0 }
 0x123   : > { %v2146_v53 = vpop.f32.mrb[20].mxu1  ;;  %v2083_v54 = vpop.f32.mrb[21].mxu0 }
 0x124   : > { %v2084_v18 = vadd.f32 %v2083_v54, %v2082_v51  ;;  %v2147_v55 = vpop.f32.mrb[21].mxu1  ;;  %v2085_v52 = vpop.f32.mrb[22].mxu0 }
 0x125   : > { %v2148_v57 = vadd.f32 %v2147_v55, %v2146_v53  ;;  %v2149_v58 = vpop.f32.mrb[22].mxu1  ;;  %v2086_v59 = vpop.f32.mrb[23].mxu0 }
 0x126   : > { %v2087_v3 = vadd.f32 %v2086_v59, %v2085_v52  ;;  %v2150_v61 = vpop.f32.mrb[23].mxu1 }
 0x127   : > { %v3010_v62 = vadd.f32 %v2148_v57, %v2084_v18  ;;  %v2151_v1 = vadd.f32 %v2150_v61, %v2149_v58 }
 0x129   : > { %v3012_v4 = vadd.f32 %v2151_v1, %v2087_v3 }
 0x12a   : > { %v2088_v5 = vpop.f32.mrb[24].mxu0 }
 0x12b   : > { %v2152_v6 = vpop.f32.mrb[24].mxu1  ;;  %v2089_v7 = vpop.f32.mrb[25].mxu0 }
 0x12c   : > { %v2090_v9 = vadd.f32 %v2089_v7, %v2088_v5  ;;  %v2153_v11 = vpop.f32.mrb[25].mxu1  ;;  %v2091_v12 = vpop.f32.mrb[26].mxu0 }
 0x12d   : > { %v2154_v13 = vadd.f32 %v2153_v11, %v2152_v6  ;;  %v2155_v14 = vpop.f32.mrb[26].mxu1  ;;  %v2092_v16 = vpop.f32.mrb[27].mxu0 }
 0x12e   : > { %v2093_v21 = vadd.f32 %v2092_v16, %v2091_v12  ;;  %v2156_v22 = vpop.f32.mrb[27].mxu1 }
 0x12f   : > { %v3014_v23 = vadd.f32 %v2154_v13, %v2090_v9  ;;  %v2157_v24 = vadd.f32 %v2156_v22, %v2155_v14 }
 0x131   : > { %v3016_v27 = vadd.f32 %v2157_v24, %v2093_v21 }
 0x132   : > { %v2094_v28 = vpop.f32.mrb[28].mxu0 }
 0x133   : > { %v2158_v31 = vpop.f32.mrb[28].mxu1  ;;  %v2095_v33 = vpop.f32.mrb[29].mxu0 }
 0x134   : > { %v2096_v36 = vadd.f32 %v2095_v33, %v2094_v28  ;;  %v2159_v37 = vpop.f32.mrb[29].mxu1  ;;  %v2097_v38 = vpop.f32.mrb[30].mxu0 }
 0x135   : > { %v2160_v39 = vadd.f32 %v2159_v37, %v2158_v31  ;;  %v2161_v34 = vpop.f32.mrb[30].mxu1  ;;  %v2098_v19 = vpop.f32.mrb[31].mxu0 }
 0x136   : > { %v2099_v40 = vadd.f32 %v2098_v19, %v2097_v38  ;;  %v2162_v41 = vpop.f32.mrb[31].mxu1 }
 0x137   : > { %v3018_v15 = vadd.f32 %v2160_v39, %v2096_v36  ;;  %v2163_v43 = vadd.f32 %v2162_v41, %v2161_v34 }
 0x139   : > { %v3020_v47 = vadd.f32 %v2163_v43, %v2099_v40 }
 0x13a   : > { %v2180_v49 = vpop.f32.mrb[32].mxu0 }
 0x13b   : > { %v2181_v50 = vpop.f32.mrb[33].mxu0  ;;  %v2244_v0 = vpop.f32.mrb[32].mxu1 }
 0x13c   : > { %v2182_v45 = vadd.f32 %v2181_v50, %v2180_v49  ;;  %v2183_v63 = vpop.f32.mrb[34].mxu0  ;;  %v2245_v17 = vpop.f32.mrb[33].mxu1 }
 0x13d   : > { %v2184_v60 = vpop.f32.mrb[35].mxu0  ;;  %v2246_v42 = vadd.f32 %v2245_v17, %v2244_v0  ;;  %v2247_v26 = vpop.f32.mrb[34].mxu1 }
 0x13e   : > { %v1386_v20 = vadd.f32 %v2182_v45, %v2990_v35  ;;  %v2185_v25 = vadd.f32 %v2184_v60, %v2183_v63  ;;  %v2248_v44 = vpop.f32.mrb[35].mxu1 }
 0x13f   : > { %v2249_v51 = vadd.f32 %v2248_v44, %v2247_v26 }
 0x140   : > { %v1389_v53 = vadd.f32 %v2185_v25, %v2992_v56  ;;  %v3024_v54 = vadd.f32 %v2246_v42, %v1386_v20 }
 0x142   : > { %v2186_v18 = vpop.f32.mrb[36].mxu0  ;;  %v3026_v55 = vadd.f32 %v2249_v51, %v1389_v53 }
 0x143   : > { %v2187_v52 = vpop.f32.mrb[37].mxu0  ;;  %v2250_v57 = vpop.f32.mrb[36].mxu1 }
 0x144   : > { %v2188_v58 = vadd.f32 %v2187_v52, %v2186_v18  ;;  %v2189_v59 = vpop.f32.mrb[38].mxu0  ;;  %v2251_v3 = vpop.f32.mrb[37].mxu1 }
 0x145   : > { %v2190_v61 = vpop.f32.mrb[39].mxu0  ;;  %v2252_v1 = vadd.f32 %v2251_v3, %v2250_v57  ;;  %v2253_v5 = vpop.f32.mrb[38].mxu1 }
 0x146   : > { %v1394_v35 = vadd.f32 %v2188_v58, %v2994_v8  ;;  %v2191_v6 = vadd.f32 %v2190_v61, %v2189_v59  ;;  %v2254_v7 = vpop.f32.mrb[39].mxu1 }
 0x147   : > { %v2255_v9 = vadd.f32 %v2254_v7, %v2253_v5 }
 0x148   : > { %v1397_v56 = vadd.f32 %v2191_v6, %v2996_v10  ;;  %v3030_v11 = vadd.f32 %v2252_v1, %v1394_v35 }
 0x14a   : > { %v2192_v12 = vpop.f32.mrb[40].mxu0  ;;  %v3032_v13 = vadd.f32 %v2255_v9, %v1397_v56 }
 0x14b   : > { %v2193_v14 = vpop.f32.mrb[41].mxu0  ;;  %v2256_v16 = vpop.f32.mrb[40].mxu1 }
 0x14c   : > { %v2194_v21 = vadd.f32 %v2193_v14, %v2192_v12  ;;  %v2195_v22 = vpop.f32.mrb[42].mxu0  ;;  %v2257_v24 = vpop.f32.mrb[41].mxu1 }
 0x14d   : > { %v2196_v28 = vpop.f32.mrb[43].mxu0  ;;  %v2258_v31 = vadd.f32 %v2257_v24, %v2256_v16  ;;  %v2259_v33 = vpop.f32.mrb[42].mxu1 }
 0x14e   : > { %v1402_v8 = vadd.f32 %v2194_v21, %v2998_v29  ;;  %v2197_v36 = vadd.f32 %v2196_v28, %v2195_v22  ;;  %v2260_v37 = vpop.f32.mrb[43].mxu1 }
 0x14f   : > { %v2261_v38 = vadd.f32 %v2260_v37, %v2259_v33 }
 0x150   : > { %v1405_v10 = vadd.f32 %v2197_v36, %v3000_v32  ;;  %v3036_v39 = vadd.f32 %v2258_v31, %v1402_v8 }
 0x152   : > { %v2198_v34 = vpop.f32.mrb[44].mxu0  ;;  %v3038_v19 = vadd.f32 %v2261_v38, %v1405_v10 }
 0x153   : > { %v2199_v40 = vpop.f32.mrb[45].mxu0  ;;  %v2262_v41 = vpop.f32.mrb[44].mxu1 }
 0x154   : > { %v2200_v43 = vadd.f32 %v2199_v40, %v2198_v34  ;;  %v2201_v49 = vpop.f32.mrb[46].mxu0  ;;  %v2263_v50 = vpop.f32.mrb[45].mxu1 }
 0x155   : > { %v2202_v0 = vpop.f32.mrb[47].mxu0  ;;  %v2264_v45 = vadd.f32 %v2263_v50, %v2262_v41  ;;  %v2265_v63 = vpop.f32.mrb[46].mxu1 }
 0x156   : > { %v1410_v29 = vadd.f32 %v2200_v43, %v3002_v46  ;;  %v2203_v17 = vadd.f32 %v2202_v0, %v2201_v49  ;;  %v2266_v60 = vpop.f32.mrb[47].mxu1 }
 0x157   : > { %v2267_v42 = vadd.f32 %v2266_v60, %v2265_v63 }
 0x158   : > { %v1413_v32 = vadd.f32 %v2203_v17, %v3004_v48  ;;  %v3042_v26 = vadd.f32 %v2264_v45, %v1410_v29 }
 0x15a   : > { %v2204_v20 = vpop.f32.mrb[48].mxu0  ;;  %v3044_v25 = vadd.f32 %v2267_v42, %v1413_v32 }
 0x15b   : > { %v2205_v44 = vpop.f32.mrb[49].mxu0  ;;  %v2268_v51 = vpop.f32.mrb[48].mxu1 }
 0x15c   : > { %v2206_v53 = vadd.f32 %v2205_v44, %v2204_v20  ;;  %v2207_v18 = vpop.f32.mrb[50].mxu0  ;;  %v2269_v52 = vpop.f32.mrb[49].mxu1 }
 0x15d   : > { %v2208_v57 = vpop.f32.mrb[51].mxu0  ;;  %v2270_v58 = vadd.f32 %v2269_v52, %v2268_v51  ;;  %v2271_v59 = vpop.f32.mrb[50].mxu1 }
 0x15e   : > { %v1418_v46 = vadd.f32 %v2206_v53, %v3006_v2  ;;  %v2209_v3 = vadd.f32 %v2208_v57, %v2207_v18  ;;  %v2272_v61 = vpop.f32.mrb[51].mxu1 }
 0x15f   : > { %v2273_v1 = vadd.f32 %v2272_v61, %v2271_v59 }
 0x160   : > { %v1421_v48 = vadd.f32 %v2209_v3, %v3008_v30  ;;  %v1515_v5 = vadd.f32 %v2270_v58, %v1418_v46 }
 0x162   : > { %v2210_v35 = vpop.f32.mrb[52].mxu0  ;;  %v3048_v6 = vadd.f32 %v2273_v1, %v1421_v48 }
 0x163   : > { %v2211_v7 = vpop.f32.mrb[53].mxu0  ;;  %v2274_v9 = vpop.f32.mrb[52].mxu1 }
 0x164   : > { %v2212_v56 = vadd.f32 %v2211_v7, %v2210_v35  ;;  %v2213_v12 = vpop.f32.mrb[54].mxu0  ;;  %v2275_v14 = vpop.f32.mrb[53].mxu1 }
 0x165   : > { %v2214_v16 = vpop.f32.mrb[55].mxu0  ;;  %v2276_v21 = vadd.f32 %v2275_v14, %v2274_v9  ;;  %v2277_v22 = vpop.f32.mrb[54].mxu1 }
 0x166   : > { %v1426_v24 = vadd.f32 %v2212_v56, %v3010_v62  ;;  %v2215_v2 = vadd.f32 %v2214_v16, %v2213_v12  ;;  %v2278_v28 = vpop.f32.mrb[55].mxu1 }
 0x167   : > { %v2279_v31 = vadd.f32 %v2278_v28, %v2277_v22 }
 0x168   : > { %v1429_v33 = vadd.f32 %v2215_v2, %v3012_v4  ;;  %v1523_v30 = vadd.f32 %v2276_v21, %v1426_v24 }
 0x16a   : > { %v2216_v8 = vpop.f32.mrb[56].mxu0  ;;  %v1526_v36 = vadd.f32 %v2279_v31, %v1429_v33 }
 0x16b   : > { %v2217_v37 = vpop.f32.mrb[57].mxu0  ;;  %v2280_v38 = vpop.f32.mrb[56].mxu1 }
 0x16c   : > { %v2218_v10 = vadd.f32 %v2217_v37, %v2216_v8  ;;  %v2219_v34 = vpop.f32.mrb[58].mxu0  ;;  %v2281_v40 = vpop.f32.mrb[57].mxu1 }
 0x16d   : > { %v2220_v41 = vpop.f32.mrb[59].mxu0  ;;  %v2282_v43 = vadd.f32 %v2281_v40, %v2280_v38  ;;  %v2283_v49 = vpop.f32.mrb[58].mxu1 }
 0x16e   : > { %v1434_v50 = vadd.f32 %v2218_v10, %v3014_v23  ;;  %v2221_v0 = vadd.f32 %v2220_v41, %v2219_v34  ;;  %v2284_v62 = vpop.f32.mrb[59].mxu1 }
 0x16f   : > { %v2285_v45 = vadd.f32 %v2284_v62, %v2283_v49 }
 0x170   : > { %v1437_v63 = vadd.f32 %v2221_v0, %v3016_v27  ;;  %v1531_v29 = vadd.f32 %v2282_v43, %v1434_v50 }
 0x172   : > { %v2222_v4 = vpop.f32.mrb[60].mxu0  ;;  %v3054_v17 = vadd.f32 %v2285_v45, %v1437_v63 }
 0x173   : > { %v2223_v60 = vpop.f32.mrb[61].mxu0  ;;  %v2286_v42 = vpop.f32.mrb[60].mxu1 }
 0x174   : > { %v2224_v32 = vadd.f32 %v2223_v60, %v2222_v4  ;;  %v2225_v20 = vpop.f32.mrb[62].mxu0  ;;  %v2287_v44 = vpop.f32.mrb[61].mxu1 }
 0x175   : > { %v2226_v51 = vpop.f32.mrb[63].mxu0  ;;  %v2288_v53 = vadd.f32 %v2287_v44, %v2286_v42  ;;  %v2289_v18 = vpop.f32.mrb[62].mxu1 }
 0x176   : > { %v1442_v23 = vadd.f32 %v2224_v32, %v3018_v15  ;;  %v2227_v52 = vadd.f32 %v2226_v51, %v2225_v20  ;;  %v2290_v57 = vpop.f32.mrb[63].mxu1 }
 0x177   : > { %v2291_v58 = vadd.f32 %v2290_v57, %v2289_v18 }
 0x178   : > { %v1445_v27 = vadd.f32 %v2227_v52, %v3020_v47  ;;  %v1539_v59 = vadd.f32 %v2288_v53, %v1442_v23 }
 0x17a   : > { %v2326_v46 = vpop.f32.mrb[64].mxu0  ;;  %v1542_v3 = vadd.f32 %v2291_v58, %v1445_v27 }
 0x17b   : > { %v1588_v61 = vadd.f32 %v2326_v46, %v3030_v11  ;;  %v2334_v1 = vpop.f32.mrb[64].mxu1  ;;  %v1579_v48 = vpop.f32.mrb[65].mxu0 }
 0x17c   : > { %v3060_v35 = vadd.f32 %v2334_v1, %v1523_v30  ;;  %v1580_v7 = vadd.f32 %v1579_v48, %v3024_v54  ;;  %v1611_v9 = vpop.f32.mrb[65].mxu1  ;;  %v2327_v56 = vpop.f32.mrb[66].mxu0 }
 0x17d   : > { %v3063_v15 = vadd.f32 %v1611_v9, %v1515_v5  ;;  %v1591_v12 = vadd.f32 %v2327_v56, %v3032_v13  ;;  %v2335_v14 = vpop.f32.mrb[66].mxu1  ;;  %v1582_v47 = vpop.f32.mrb[67].mxu0  ;;  %v1665_v33 = vmul.f32 %v1588_v61, %v1588_v61 }
 0x17e   : > { %v3071_v11 = vadd.f32 %v2335_v14, %v1526_v36  ;;  %v1583_v16 = vadd.f32 %v1582_v47, %v3026_v55  ;;  %v1614_v54 = vpop.f32.mrb[67].mxu1  ;;  %v1663_v13 = vmul.f32 %v1580_v7, %v1580_v7  ;;  %v1673_v48 = vmul.f32 %v3060_v35, %v3060_v35 }
 0x17f   : > { %v1997_v21 = vpack.c.bf16 %v1591_v12, %v1588_v61  ;;  %v1615_v5 = vadd.f32 %v1614_v54, %v3048_v6  ;;  %v1666_v36 = vmul.f32 %v1591_v12, %v1591_v12 }
 0x180   : > { %v2017_v22 = vpack.c.bf16 %v3071_v11, %v3060_v35  ;;  %v1642_v24 = vadd.f32 %v1583_v16, %v1580_v7  ;;  %v1664_v2 = vmul.f32 %v1583_v16, %v1583_v16  ;;  %v1992_v28 = vpack.c.bf16 %v1583_v16, %v1580_v7 }
 0x181   : > { %2029 = vst [vmem:[%s3069_s14 + $0x8] sm:$0xff] %v1997_v21   ;;  %v2012_v31 = vpack.c.bf16 %v1615_v5, %v3063_v15  ;;  %v1674_v56 = vmul.f32 %v3071_v11, %v3071_v11 }
 0x182   : > { %2033 = vst [vmem:[%s3069_s14 + $0x28] sm:$0xff] %v2017_v22   ;;  %v1643_v30 = vadd.f32 %v1642_v24, %v1588_v61  ;;  %v1679_v55 = vadd.f32 %v1664_v2, %v1663_v13  ;;  %v2330_v8 = vpop.f32.mrb[68].mxu0  ;;  %1993 = vst [vmem:[%s3069_s14] sm:$0xff] %v1992_v28  }
 0x183   : > { %2032 = vst [vmem:[%s3069_s14 + $0x20] sm:$0xff] %v2012_v31   ;;  %v1604_v6 = vadd.f32 %v2330_v8, %v3042_v26  ;;  %v2338_v37 = vpop.f32.mrb[68].mxu1  ;;  %v1595_v38 = vpop.f32.mrb[69].mxu0 }
 0x184   : > { %v1680_v10 = vadd.f32 %v1679_v55, %v1665_v33  ;;  %v1636_v34 = vadd.f32 %v2338_v37, %v1539_v59  ;;  %v1596_v40 = vadd.f32 %v1595_v38, %v3036_v39  ;;  %v1644_v41 = vadd.f32 %v1643_v30, %v1591_v12  ;;  %v1627_v43 = vpop.f32.mrb[69].mxu1  ;;  %v2331_v49 = vpop.f32.mrb[70].mxu0 }
 0x185   : > { %v1628_v50 = vadd.f32 %v1627_v43, %v1531_v29  ;;  %v1607_v0 = vadd.f32 %v2331_v49, %v3044_v25  ;;  %v2339_v62 = vpop.f32.mrb[70].mxu1  ;;  %v1598_v45 = vpop.f32.mrb[71].mxu0  ;;  %v1669_v23 = vmul.f32 %v1604_v6, %v1604_v6 }
 0x186   : > { %v1645_v63 = vadd.f32 %v1644_v41, %v1596_v40  ;;  %v1667_v4 = vmul.f32 %v1596_v40, %v1596_v40  ;;  %v1681_v60 = vadd.f32 %v1680_v10, %v1666_v36  ;;  %v1630_v26 = vpop.f32.mrb[71].mxu1  ;;  %v1639_v32 = vadd.f32 %v2339_v62, %v1542_v3 }
 0x187   : > { %v2007_v42 = vpack.c.bf16 %v1607_v0, %v1604_v6  ;;  %v1599_v39 = vadd.f32 %v1598_v45, %v3038_v19  ;;  %v1631_v44 = vadd.f32 %v1630_v26, %v3054_v17  ;;  %v1670_v58 = vmul.f32 %v1607_v0, %v1607_v0 }
 0x188   : > { %v1682_v20 = vadd.f32 %v1681_v60, %v1667_v4  ;;  %v2027_v29 = vpack.c.bf16 %v1639_v32, %v1636_v34  ;;  %v1671_v19 = vmul.f32 %v3063_v15, %v3063_v15  ;;  %v1672_v3 = vmul.f32 %v1615_v5, %v1615_v5 }
 0x189   : > { %2031 = vst [vmem:[%s3069_s14 + $0x18] sm:$0xff] %v2007_v42   ;;  %v1646_v51 = vadd.f32 %v1645_v63, %v1599_v39  ;;  %v1668_v25 = vmul.f32 %v1599_v39, %v1599_v39  ;;  %v2002_v53 = vpack.c.bf16 %v1599_v39, %v1596_v40  ;;  %v2022_v18 = vpack.c.bf16 %v1631_v44, %v1628_v50 }
 0x18a   : > { %2035 = vst [vmem:[%s3069_s14 + $0x38] sm:$0xff] %v2027_v29   ;;  %v1675_v47 = vmul.f32 %v1628_v50, %v1628_v50  ;;  %v1676_v21 = vmul.f32 %v1631_v44, %v1631_v44  ;;  %v1677_v22 = vmul.f32 %v1636_v34, %v1636_v34  ;;  %v1678_v2 = vmul.f32 %v1639_v32, %v1639_v32 }
 0x18b   : > { %v1647_v52 = vadd.f32 %v1646_v51, %v1604_v6  ;;  %v1683_v57 = vadd.f32 %v1682_v20, %v1668_v25  ;;  %2030 = vst [vmem:[%s3069_s14 + $0x10] sm:$0xff] %v2002_v53   ;;  %2034 = vst [vmem:[%s3069_s14 + $0x30] sm:$0xff] %v2022_v18  }
 0x18d   : > { %v1648_v27 = vadd.f32 %v1647_v52, %v1607_v0  ;;  %v1684_v59 = vadd.f32 %v1683_v57, %v1669_v23 }
 0x18f   : > { %v1649_v17 = vadd.f32 %v1648_v27, %v3063_v15  ;;  %v1685_v46 = vadd.f32 %v1684_v59, %v1670_v58 }
 0x191   : > { %v1686_v61 = vadd.f32 %v1685_v46, %v1671_v19  ;;  %v1650_v1 = vadd.f32 %v1649_v17, %v1615_v5 }
 0x193   : > { %v1651_v7 = vadd.f32 %v1650_v1, %v3060_v35  ;;  %v1687_v9 = vadd.f32 %v1686_v61, %v1672_v3 }
 0x195   : > { %v1652_v12 = vadd.f32 %v1651_v7, %v3071_v11  ;;  %v1688_v14 = vadd.f32 %v1687_v9, %v1673_v48 }
 0x197   : > { %v1653_v16 = vadd.f32 %v1652_v12, %v1628_v50  ;;  %v1689_v54 = vadd.f32 %v1688_v14, %v1674_v56 }
 0x199   : > { %v1654_v15 = vadd.f32 %v1653_v16, %v1631_v44  ;;  %v1690_v13 = vadd.f32 %v1689_v54, %v1675_v47 }
 0x19b   : > { %v1655_v5 = vadd.f32 %v1654_v15, %v1636_v34  ;;  %v1691_v24 = vadd.f32 %v1690_v13, %v1676_v21 }
 0x19d   : > { %v1656_v28 = vadd.f32 %v1655_v5, %v1639_v32  ;;  %v1692_v35 = vadd.f32 %v1691_v24, %v1677_v22 }
 0x19f   : > { %v1657_v31 = vrot.slane %v1656_v28, 4  ;;  %v1693_v33 = vadd.f32 %v1692_v35, %v1678_v2 }
 0x1a1   : > { %v1658_v30 = vadd.f32 %v1657_v31, %v1656_v28  ;;  %v1694_v55 = vrot.slane %v1693_v33, 4 }
 0x1a3   : > { %v1659_v8 = vrot.slane %v1658_v30, 2  ;;  %v1695_v11 = vadd.f32 %v1694_v55, %v1693_v33 }
 0x1a5   : > { %v1660_v36 = vadd.f32 %v1659_v8, %v1658_v30  ;;  %v1696_v6 = vrot.slane %v1695_v11, 2 }
 0x1a7   : > { %v1661_v37 = vrot.slane %v1660_v36, 1  ;;  %v1697_v38 = vadd.f32 %v1696_v6, %v1695_v11 }
 0x1a9   : > { %v1698_v10 = vrot.slane %v1697_v38, 1  ;;  %v1662_v34 = vadd.f32 %v1661_v37, %v1660_v36 }
 0x1ab   : > { %v1699_v40 = vadd.f32 %v1698_v10, %v1697_v38 }
 0x1ad   : > { %v1701_v41 = vsel %vm395_vm1, %v1662_v34, %v1699_v40 }
 0x1ae   : > { %1702 = vst [vmem:[%s235_s20] sm:$0x3] %v1701_v41 }
 0x1af PF: > { %s16_s18 = sadd.s32 1, %s2443_s18  }
 0x1b0   : > { %p13_p4 = scmp.ge.s32.totalorder %s16_s18, 4  }
 0x1b2   :  { %15 = sbr.rel (!%p13_p4) target bundleno = 1 (0x1), region = 78 }

// kernel: resblock3d_forward.3
= control target key start
LH: loop header
LB: loop body
LE: loop exit
PB: predicated region body
PF: predicated region fallthrough
CT: control target
= control target key end

     0   :  { %s2391_s21 = smov 0   ;;  %s3044_s0 = inlined_call_operand.vmem [shape: bf16[2,8,16,128], index: 0, kind: input, shape index: {}]   ;;  %s3045_s1 = inlined_call_operand.vmem [shape: bf16[1152,128], index: 1, kind: input, shape index: {}]   ;;  %s3046_s2 = inlined_call_operand.vmem [shape: f32[1,128], index: 2, kind: input, shape index: {}]   ;;  %s3047_s3 = inlined_call_operand.vmem [shape: f32[1,128], index: 3, kind: input, shape index: {}]   ;;  %s3048_s4 = inlined_call_operand.vmem [shape: f32[1,128], index: 4, kind: input, shape index: {}]   ;;  %s3049_s5 = inlined_call_operand.vmem [shape: f32[2,8,16,128], index: 5, kind: input, shape index: {}]   ;;  %s3050_s6 = inlined_call_operand.vmem [shape: f32[2,8,16,128], index: 6, kind: output, shape index: {}]  }
   0x1 LB: > { %s1816_s22 = sadd.s32 4294967295, %s2353_s21   ;;  %p1820_p0 = scmp.ge.s32.totalorder %s2353_s21, 1  ;;  %s2353_s21 = sphi %s2391_s21, %s16_s21  }
   0x2   : > { %p222_p1 = scmp.lt.s32.totalorder %s2353_s21, 3 }
   0x4   : > { %p223_p2 = pnand %p1820_p0, %p222_p1 }
   0x5   : > { %v2275_v0 = vld [vmem:[%s3045_s1 + $0x40] sm:$0xff] (!%p223_p2)   ;;  %v2355_v2 = vmov (!%p223_p2), 0   ;;  %v2279_v6 = vld [vmem:[%s3045_s1 + $0x48] sm:$0xff] (!%p223_p2)   ;;  %v2283_v10 = vld [vmem:[%s3045_s1 + $0x50] sm:$0xff] (!%p223_p2)   ;;  %p257_p3 = scmp.lt.s32.totalorder (!%p223_p2), %s1816_s22, 1  ;;  %vm447_vm0 = vcmask (!%p223_p2), 1040384  }
   0x6   : > { %226 = sbr.rel (%p223_p2) target bundleno = 396 (0x18c), region = 44  ;;  %v2276_v1 = vld [vmem:[%s3045_s1 + $0xc0] sm:$0xff] (!%p223_p2)   ;;  %v2406_v3 = vrot.slane (!%p223_p2), %v2355_v2, 1  ;;  %1946 = vmatprep.subr.bf16.mxu0 (!%p223_p2), %v2275_v0  ;;  %v2280_v7 = vld [vmem:[%s3045_s1 + $0xc8] sm:$0xff] (!%p223_p2)   ;;  %v2284_v11 = vld [vmem:[%s3045_s1 + $0xd0] sm:$0xff] (!%p223_p2)   ;;  %vm582_vm2 = vcmask (!%p223_p2), 1046528  }
   0x7   : > { %v2277_v4 = vld [vmem:[%s3045_s1] sm:$0xff] (!%p223_p2)   ;;  %2010 = vmatprep.subr.bf16.mxu1 (!%p223_p2), %v2276_v1  ;;  %v2281_v8 = vld [vmem:[%s3045_s1 + $0x8] sm:$0xff] (!%p223_p2)   ;;  %v2285_v12 = vld [vmem:[%s3045_s1 + $0x10] sm:$0xff] (!%p223_p2)   ;;  %vm448_vm1 = vsmask.f32 (!%p223_p2), 256 }
   0x8   : > { %v2278_v5 = vld [vmem:[%s3045_s1 + $0x80] sm:$0xff] (!%p223_p2)   ;;  %1248 = vmatprep.mubr.bf16.mxu0 (!%p223_p2), %v2406_v3  ;;  %1947 = vmatpush3.bf16.msra.mxu0 (!%p223_p2), %v2277_v4  ;;  %v2282_v9 = vld [vmem:[%s3045_s1 + $0x88] sm:$0xff] (!%p223_p2)   ;;  %v2286_v13 = vld [vmem:[%s3045_s1 + $0x90] sm:$0xff] (!%p223_p2)   ;;  %vm466_vm4 = vsmask.f32 (!%p223_p2), 7424 }
   0x9   : > { %2011 = vmatpush3.bf16.msra.mxu1 (!%p223_p2), %v2278_v5  ;;  %1948 = vmatprep.subr.bf16.mxu0 (!%p223_p2), %v2279_v6  ;;  %v2287_v14 = vld [vmem:[%s3045_s1 + $0x58] sm:$0xff] (!%p223_p2)   ;;  %v2291_v18 = vld [vmem:[%s3045_s1 + $0x60] sm:$0xff] (!%p223_p2)   ;;  %v2295_v22 = vld [vmem:[%s3045_s1 + $0x68] sm:$0xff] (!%p223_p2)  }
   0xa   : > { %2012 = vmatprep.subr.bf16.mxu1 (!%p223_p2), %v2280_v7  ;;  %v2288_v15 = vld [vmem:[%s3045_s1 + $0xd8] sm:$0xff] (!%p223_p2)   ;;  %v2292_v19 = vld [vmem:[%s3045_s1 + $0xe0] sm:$0xff] (!%p223_p2)   ;;  %v2296_v23 = vld [vmem:[%s3045_s1 + $0xe8] sm:$0xff] (!%p223_p2)  }
   0xb   : > { %v2289_v16 = vld [vmem:[%s3045_s1 + $0x18] sm:$0xff] (!%p223_p2)   ;;  %v2293_v20 = vld [vmem:[%s3045_s1 + $0x20] sm:$0xff] (!%p223_p2)   ;;  %v2297_v24 = vld [vmem:[%s3045_s1 + $0x28] sm:$0xff] (!%p223_p2)  }
   0xc   : > { %1949 = vmatpush3.bf16.msra.mxu0 (!%p223_p2), %v2281_v8  ;;  %v2290_v17 = vld [vmem:[%s3045_s1 + $0x98] sm:$0xff] (!%p223_p2)   ;;  %v2294_v21 = vld [vmem:[%s3045_s1 + $0xa0] sm:$0xff] (!%p223_p2)   ;;  %v2298_v25 = vld [vmem:[%s3045_s1 + $0xa8] sm:$0xff] (!%p223_p2)  }
   0xd   : > { %2013 = vmatpush3.bf16.msra.mxu1 %v2282_v9  ;;  %1950 = vmatprep.subr.bf16.mxu0 %v2283_v10  ;;  %s3054_s22 = smov (!%p257_p3, %s1816_s22), 1  ;;  %v2299_v26 = vld [vmem:[%s3045_s1 + $0x70] sm:$0xff]   ;;  %v2303_v30 = vld [vmem:[%s3045_s1 + $0x78] sm:$0xff]   ;;  %v2514_v34 = vld [vmem:[%s3046_s2] ss:$0 sm:$0xff] }
   0xe   : > { %2014 = vmatprep.subr.bf16.mxu1 %v2284_v11  ;;  %v2300_v27 = vld [vmem:[%s3045_s1 + $0xf0] sm:$0xff]   ;;  %s1904_s9 = sshll.u32 %s3054_s22, 6  ;;  %v2304_v31 = vld [vmem:[%s3045_s1 + $0xf8] sm:$0xff]   ;;  %v2520_v38 = vld [vmem:[%s3047_s3] ss:$0 sm:$0xff]  ;;  %s1905_s25 = sshll.u32 %s3054_s22, 7 }
   0xf   : > { %v2301_v28 = vld [vmem:[%s3045_s1 + $0x30] sm:$0xff]   ;;  %s2503_s18 = scalar_lea.vmem %s3044_s0, %s1904_s9  ;;  %v2305_v32 = vld [vmem:[%s3045_s1 + $0x38] sm:$0xff]   ;;  %v2307_v39 = vld [vmem:[%s3045_s1 + $0x140] sm:$0xff]   ;;  %s2989_s28 = scalar_lea.vmem %s3049_s5, %s1905_s25 }
  0x10   : > { %1951 = vmatpush3.bf16.msra.mxu0 %v2285_v12  ;;  %v2302_v29 = vld [vmem:[%s3045_s1 + $0xb0] sm:$0xff]   ;;  %v2306_v33 = vld [vmem:[%s3045_s1 + $0xb8] sm:$0xff]   ;;  %v1908_v35 = vld [vmem:[%s2503_s18] sm:$0xff]   ;;  %s2999_s30 = scalar_lea.vmem %s3050_s6, %s1905_s25 }
  0x11   : > { %2015 = vmatpush3.bf16.msra.mxu1 %v2286_v13  ;;  %1952 = vmatprep.subr.bf16.mxu0 %v2287_v14  ;;  %v1909_v36 = vunpack.c.l.bf16 %v1908_v35  ;;  %v1910_v37 = vunpack.c.h.bf16 %v1908_v35  ;;  %v2308_v42 = vld [vmem:[%s3045_s1 + $0x1c0] sm:$0xff]   ;;  %v1939_v46 = vld [vmem:[%s2503_s18 + $0x8] sm:$0xff]   ;;  %v1940_v58 = vld [vmem:[%s2503_s18 + $0x10] sm:$0xff]  }
  0x12   : > { %2016 = vmatprep.subr.bf16.mxu1 %v2288_v15  ;;  %v2309_v43 = vld [vmem:[%s3045_s1 + $0x100] sm:$0xff]   ;;  %v1913_v47 = vunpack.c.l.bf16 %v1939_v46  ;;  %v1914_v48 = vunpack.c.h.bf16 %v1939_v46  ;;  %v2311_v49 = vld [vmem:[%s3045_s1 + $0x148] sm:$0xff]   ;;  %v1917_v61 = vunpack.c.l.bf16 %v1940_v58  ;;  %v1918_v62 = vunpack.c.h.bf16 %v1940_v58  ;;  %v2315_v63 = vld [vmem:[%s3045_s1 + $0x150] sm:$0xff]  }
  0x13   : > { %v313_v40 = vmul.f32 %v1909_v36, %v2514_v34  ;;  %v314_v41 = vmul.f32 %v1910_v37, %v2514_v34  ;;  %v2313_v55 = vld [vmem:[%s3045_s1 + $0x108] sm:$0xff]   ;;  %v2317_v7 = vld [vmem:[%s3045_s1 + $0x110] sm:$0xff]   ;;  %vm2558_vm3 = vmand %vm447_vm0, %vm448_vm1 }
  0x14   : > { %1953 = vmatpush3.bf16.msra.mxu0 %v2289_v16  ;;  %v315_v52 = vmul.f32 %v1913_v47, %v2514_v34  ;;  %v316_v53 = vmul.f32 %v1914_v48, %v2514_v34  ;;  %v317_v5 = vmul.f32 %v1917_v61, %v2514_v34  ;;  %v318_v6 = vmul.f32 %v1918_v62, %v2514_v34  ;;  %v1941_v14 = vld [vmem:[%s2503_s18 + $0x18] sm:$0xff]   ;;  %v2310_v15 = vld [vmem:[%s3045_s1 + $0x180] sm:$0xff]   ;;  %v2318_v48 = vld [vmem:[%s3045_s1 + $0x190] sm:$0xff]  }
  0x15   : > { %2017 = vmatpush3.bf16.msra.mxu1 %v2290_v17  ;;  %1954 = vmatprep.subr.bf16.mxu0 %v2291_v18  ;;  %v335_v44 = vadd.f32 %v2520_v38, %v313_v40  ;;  %v336_v45 = vadd.f32 %v2520_v38, %v314_v41  ;;  %v1922_v35 = vunpack.c.h.bf16 %v1941_v14  ;;  %v2325_v61 = vld [vmem:[%s3045_s1 + $0x120] sm:$0xff]  }
  0x16   : > { %2018 = vmatprep.subr.bf16.mxu1 %v2292_v19  ;;  %v337_v56 = vadd.f32 %v2520_v38, %v315_v52  ;;  %v338_v57 = vadd.f32 %v2520_v38, %v316_v53  ;;  %v339_v12 = vadd.f32 %v2520_v38, %v317_v5  ;;  %v340_v13 = vadd.f32 %v2520_v38, %v318_v6  ;;  %v2312_v19 = vld [vmem:[%s3045_s1 + $0x1c8] sm:$0xff]  }
  0x17   : > { %v351_v50 = vmax.f32 %v335_v44, 0.0  ;;  %v352_v51 = vmax.f32 %v336_v45, 0.0  ;;  %v2316_v44 = vld [vmem:[%s3045_s1 + $0x1d0] sm:$0xff]  }
  0x18   : > { %1955 = vmatpush3.bf16.msra.mxu0 %v2293_v20  ;;  %v353_v0 = vmax.f32 %v337_v56, 0.0  ;;  %v354_v1 = vmax.f32 %v338_v57, 0.0  ;;  %v2319_v20 = vld [vmem:[%s3045_s1 + $0x158] sm:$0xff]  }
  0x19   : > { %2019 = vmatpush3.bf16.msra.mxu1 %v2294_v21  ;;  %1956 = vmatprep.subr.bf16.mxu0 %v2295_v22  ;;  %v367_v54 = vpack.c.bf16 %v352_v51, %v351_v50  ;;  %v355_v22 = vmax.f32 %v339_v12, 0.0  ;;  %v1942_v50 = vld [vmem:[%s2503_s18 + $0x20] sm:$0xff]   ;;  %v2320_v56 = vld [vmem:[%s3045_s1 + $0x1d8] sm:$0xff]  }
  0x1a   : > { %2020 = vmatprep.subr.bf16.mxu1 %v2296_v23  ;;  %v368_v9 = vpack.c.bf16 %v354_v1, %v353_v0  ;;  %v356_v23 = vmax.f32 %v340_v13, 0.0  ;;  %v2323_v51 = vld [vmem:[%s3045_s1 + $0x160] sm:$0xff]   ;;  %v1925_v1 = vunpack.c.l.bf16 %v1942_v50  ;;  %v1926_v13 = vunpack.c.h.bf16 %v1942_v50 }
  0x1b   : > { %v376_v59 = vshrl.u32 %v367_v54, 16  ;;  %v379_v60 = vshll.u32 %v367_v54, 16 }
  0x1c   : > { %1957 = vmatpush3.bf16.msra.mxu0 %v2297_v24  ;;  %v383_v17 = vshrl.u32 %v368_v9, 16  ;;  %v386_v18 = vshll.u32 %v368_v9, 16  ;;  %v1921_v24 = vunpack.c.l.bf16 %v1941_v14  ;;  %v2322_v9 = vld [vmem:[%s3045_s1 + $0x198] sm:$0xff]   ;;  %v1943_v14 = vld [vmem:[%s2503_s18 + $0x28] sm:$0xff]  }
  0x1d   : > { %2021 = vmatpush3.bf16.msra.mxu1 %v2298_v25  ;;  %1958 = vmatprep.subr.bf16.mxu0 %v2299_v26  ;;  %v378_v4 = vrot.slane %v376_v59, 7  ;;  %v2321_v25 = vld [vmem:[%s3045_s1 + $0x118] sm:$0xff]  }
  0x1e   : > { %2022 = vmatprep.subr.bf16.mxu1 %v2300_v27  ;;  %v319_v40 = vmul.f32 %v1921_v24, %v2514_v34  ;;  %v322_v24 = vmul.f32 %v1926_v13, %v2514_v34 }
  0x1f   : > { %v381_v10 = vor.u32 %v379_v60, %v378_v4  ;;  %v458_v11 = vsel %vm2558_vm3, %v378_v4, 0 }
  0x20   : > { %1959 = vmatpush3.bf16.msra.mxu0 %v2301_v28  ;;  %v483_v16 = vshll.u32 %v458_v11, 16  ;;  %v385_v28 = vrot.slane %v383_v17, 7  ;;  %v341_v59 = vadd.f32 %v2520_v38, %v319_v40  ;;  %v1944_v40 = vld [vmem:[%s2503_s18 + $0x30] sm:$0xff]  }
  0x21   : > { %2023 = vmatpush3.bf16.msra.mxu1 %v2302_v29  ;;  %1960 = vmatprep.subr.bf16.mxu0 %v2303_v30  ;;  %v450_v21 = vsel %vm2558_vm3, 0, %v381_v10  ;;  %v586_v29 = vrot.slane %v458_v11, 1  ;;  %v2314_v30 = vld [vmem:[%s3045_s1 + $0x188] sm:$0xff]  }
  0x22   : > { %2024 = vmatprep.subr.bf16.mxu1 %v2304_v31  ;;  %1345 = vmatprep.mubr.bf16.mxu1 %v450_v21  ;;  %v476_v26 = vshrl.u32 %v450_v21, 16  ;;  %v478_v27 = vshll.u32 %v450_v21, 16  ;;  %v485_v31 = vrot.slane %v483_v16, 1  ;;  %v388_v37 = vor.u32 %v386_v18, %v385_v28 }
  0x23   : > { %v357_v6 = vmax.f32 %v341_v59, 0.0  ;;  %v2330_v59 = vld [vmem:[%s3045_s1 + $0x1a8] sm:$0xff]  }
  0x24   : > { %1961 = vmatpush3.bf16.msra.mxu0 %v2305_v32  ;;  %v585_v32 = vrot.slane %v450_v21, 1  ;;  %v480_v36 = vrot.slane %v478_v27, 1  ;;  %v2596_v46 = vsel %vm2558_vm3, 0, %v388_v37 }
  0x25   : > { %2025 = vmatpush3.bf16.msra.mxu1 %v2306_v33  ;;  %2074 = vmatprep.subr.bf16.mxu0 %v2307_v39  ;;  %v369_v33 = vpack.c.bf16 %v356_v23, %v355_v22  ;;  %v2587_v39 = vsel %vm2558_vm3, %v385_v28, 0  ;;  %v488_v52 = vshrl.u32 %v2596_v46, 16  ;;  %v490_v53 = vshll.u32 %v2596_v46, 16 }
  0x26   : > { %2138 = vmatprep.subr.bf16.mxu1 %v2308_v42  ;;  %v495_v41 = vshll.u32 %v2587_v39, 16  ;;  %v481_v45 = vor.u32 %v480_v36, %v476_v26  ;;  %v2599_v47 = vsel %vm582_vm2, %v585_v32, %v586_v29  ;;  %v588_v4 = vrot.slane %v2596_v46, 1  ;;  %v2326_v29 = vld [vmem:[%s3045_s1 + $0x1a0] sm:$0xff]  }
  0x27   : > { %1249 = vmatmul.mubr.bf16.vlgmr.msra.gmra.mrb[0].mxu0 %v2355_v2  ;;  %v390_v42 = vshrl.u32 %v369_v33, 16  ;;  %v492_v62 = vrot.slane %v490_v53, 1  ;;  %v321_v23 = vmul.f32 %v1925_v1, %v2514_v34  ;;  %v344_v32 = vadd.f32 %v2520_v38, %v322_v24  ;;  %v2333_v53 = vld [vmem:[%s3045_s1 + $0x130] sm:$0xff]   ;;  %v1945_v1 = vld [vmem:[%s2503_s18 + $0x38] sm:$0xff]  }
  0x28   : > { %2075 = vmatpush3.bf16.msra.mxu0 %v2309_v43  ;;  %1346 = vmatmul.mubr.bf16.vlgmr.msra.gmra.mrb[0].mxu1 %v2406_v3  ;;  %v393_v43 = vshll.u32 %v369_v33, 16  ;;  %v2617_v57 = vsel %vm466_vm4, %v481_v45, %v485_v31  ;;  %v497_v58 = vrot.slane %v495_v41, 1  ;;  %v1930_v33 = vunpack.c.h.bf16 %v1943_v14 }
  0x29   : > { %2076 = vmatprep.subr.bf16.mxu0 %v2311_v49  ;;  %2139 = vmatpush3.bf16.msra.mxu1 %v2310_v15  ;;  %v320_v49 = vmul.f32 %v1922_v35, %v2514_v34  ;;  %v392_v54 = vrot.slane %v390_v42, 7  ;;  %v493_v10 = vor.u32 %v492_v62, %v488_v52  ;;  %v2327_v15 = vld [vmem:[%s3045_s1 + $0x168] sm:$0xff]   ;;  %v343_v31 = vadd.f32 %v2520_v38, %v321_v23 }
  0x2a   : > { %2140 = vmatprep.subr.bf16.mxu1 %v2312_v19  ;;  %1353 = vmatprep.mubr.bf16.mxu1 %v2596_v46  ;;  %v360_v42 = vmax.f32 %v344_v32, 0.0  ;;  %v1933_v45 = vunpack.c.l.bf16 %v1944_v40  ;;  %v1934_v62 = vunpack.c.h.bf16 %v1944_v40  ;;  %v1938_v23 = vunpack.c.h.bf16 %v1945_v1 }
  0x2b   : > { %v342_v60 = vadd.f32 %v2520_v38, %v320_v49  ;;  %1256 = vmatprep.mubr.bf16.mxu0 %v2617_v57  ;;  %v2627_v0 = vsel %vm2558_vm3, %v392_v54, 0  ;;  %v359_v41 = vmax.f32 %v343_v31, 0.0 }
  0x2c   : > { %2077 = vmatpush3.bf16.msra.mxu0 %v2313_v55  ;;  %v589_v55 = vrot.slane %v2587_v39, 1  ;;  %v507_v5 = vshll.u32 %v2627_v0, 16  ;;  %v592_v12 = vrot.slane %v2627_v0, 1  ;;  %v2332_v0 = vld [vmem:[%s3045_s1 + $0x1f0] sm:$0xff]   ;;  %v326_v13 = vmul.f32 %v1934_v62, %v2514_v34 }
  0x2d   : > { %2078 = vmatprep.subr.bf16.mxu0 %v2315_v63  ;;  %2141 = vmatpush3.bf16.msra.mxu1 %v2314_v30  ;;  %v395_v63 = vor.u32 %v393_v43, %v392_v54  ;;  %v1929_v30 = vunpack.c.l.bf16 %v1943_v14  ;;  %v324_v43 = vmul.f32 %v1930_v33, %v2514_v34  ;;  %v2335_v14 = vld [vmem:[%s3045_s1 + $0x178] sm:$0xff]  }
  0x2e   : > { %2142 = vmatprep.subr.bf16.mxu1 %v2316_v44  ;;  %v509_v18 = vrot.slane %v507_v5, 1  ;;  %v2666_v35 = vsel %vm582_vm2, %v588_v4, %v589_v55  ;;  %v2328_v44 = vld [vmem:[%s3045_s1 + $0x1e8] sm:$0xff]   ;;  %v2336_v33 = vld [vmem:[%s3045_s1 + $0x1f8] sm:$0xff]  }
  0x2f   : > { %1257 = vmatmul.mubr.bf16.gmra.mrb[4].mxu0 %v450_v21  ;;  %v2637_v11 = vsel %vm2558_vm3, 0, %v395_v63  ;;  %v2651_v21 = vsel %vm466_vm4, %v493_v10, %v497_v58  ;;  %v323_v39 = vmul.f32 %v1929_v30, %v2514_v34  ;;  %v346_v58 = vadd.f32 %v2520_v38, %v324_v43 }
  0x30   : > { %2079 = vmatpush3.bf16.msra.mxu0 %v2317_v7  ;;  %v358_v7 = vmax.f32 %v342_v60, 0.0  ;;  %1354 = vmatmul.mubr.bf16.gmra.mrb[4].mxu1 %v2599_v47  ;;  %v500_v16 = vshrl.u32 %v2637_v11, 16  ;;  %v502_v17 = vshll.u32 %v2637_v11, 16  ;;  %v591_v22 = vrot.slane %v2637_v11, 1 }
  0x31   : > { %2080 = vmatprep.subr.bf16.mxu0 %v2319_v20  ;;  %1361 = vmatprep.mubr.bf16.mxu1 %v2637_v11  ;;  %v2324_v20 = vld [vmem:[%s3045_s1 + $0x1e0] sm:$0xff]   ;;  %v345_v52 = vadd.f32 %v2520_v38, %v323_v39  ;;  %v325_v63 = vmul.f32 %v1933_v45, %v2514_v34 }
  0x32   : > { %2143 = vmatpush3.bf16.msra.mxu1 %v2318_v48  ;;  %v370_v19 = vpack.c.bf16 %v358_v7, %v357_v6  ;;  %1264 = vmatprep.mubr.bf16.mxu0 %v2651_v21  ;;  %v504_v26 = vrot.slane %v502_v17, 1  ;;  %v2331_v48 = vld [vmem:[%s3045_s1 + $0x170] sm:$0xff]   ;;  %v2692_v54 = vsel %vm582_vm2, %v591_v22, %v592_v12  ;;  %v362_v12 = vmax.f32 %v346_v58, 0.0 }
  0x33   : > { %2144 = vmatprep.subr.bf16.mxu1 %v2320_v56  ;;  %v371_v56 = vpack.c.bf16 %v360_v42, %v359_v41  ;;  %v347_v17 = vadd.f32 %v2520_v38, %v325_v63  ;;  %v348_v22 = vadd.f32 %v2520_v38, %v326_v13 }
  0x34   : > { %2081 = vmatpush3.bf16.msra.mxu0 %v2321_v25  ;;  %v2329_v25 = vld [vmem:[%s3045_s1 + $0x128] sm:$0xff]   ;;  %v397_v27 = vshrl.u32 %v370_v19, 16  ;;  %v400_v28 = vshll.u32 %v370_v19, 16  ;;  %v505_v36 = vor.u32 %v504_v26, %v500_v16 }
  0x35   : > { %2082 = vmatprep.subr.bf16.mxu0 %v2323_v51  ;;  %v404_v6 = vshrl.u32 %v371_v56, 16  ;;  %v407_v10 = vshll.u32 %v371_v56, 16  ;;  %v364_v39 = vmax.f32 %v348_v22, 0.0 }
  0x36   : > { %v399_v37 = vrot.slane %v397_v27, 7  ;;  %2145 = vmatpush3.bf16.msra.mxu1 %v2322_v9  ;;  %v2679_v49 = vsel %vm466_vm4, %v505_v36, %v509_v18  ;;  %v1937_v18 = vunpack.c.l.bf16 %v1945_v1  ;;  %v363_v27 = vmax.f32 %v347_v17, 0.0 }
  0x37   : > { %2146 = vmatprep.subr.bf16.mxu1 %v2324_v20  ;;  %1265 = vmatmul.mubr.bf16.gmra.mrb[8].mxu0 %v2596_v46  ;;  %v406_v16 = vrot.slane %v404_v6, 7 }
  0x38   : > { %2083 = vmatpush3.bf16.msra.mxu0 %v2325_v61  ;;  %v402_v50 = vor.u32 %v400_v28, %v399_v37  ;;  %v2683_v51 = vsel %vm2558_vm3, %v399_v37, 0  ;;  %1362 = vmatmul.mubr.bf16.gmra.mrb[8].mxu1 %v2666_v35  ;;  %v361_v61 = vmax.f32 %v345_v52, 0.0  ;;  %v2334_v28 = vld [vmem:[%s3045_s1 + $0x1b0] sm:$0xff]   ;;  %v327_v40 = vmul.f32 %v1937_v18, %v2514_v34 }
  0x39   : > { %2084 = vmatprep.subr.bf16.mxu0 %v2327_v15  ;;  %1272 = vmatprep.mubr.bf16.mxu0 %v2679_v49  ;;  %v519_v55 = vshll.u32 %v2683_v51, 16  ;;  %v595_v7 = vrot.slane %v2683_v51, 1  ;;  %v2721_v26 = vsel %vm2558_vm3, %v406_v16, 0  ;;  %v2338_v51 = vld [vmem:[%s3045_s1 + $0x1b8] sm:$0xff]  }
  0x3a   : > { %v2701_v60 = vsel %vm2558_vm3, 0, %v402_v50  ;;  %2147 = vmatpush3.bf16.msra.mxu1 %v2326_v29  ;;  %v372_v20 = vpack.c.bf16 %v362_v12, %v361_v61  ;;  %v2337_v29 = vld [vmem:[%s3045_s1 + $0x138] sm:$0xff]   ;;  %v531_v30 = vshll.u32 %v2721_v26, 16  ;;  %v328_v50 = vmul.f32 %v1938_v23, %v2514_v34 }
  0x3b   : > { %1369 = vmatprep.mubr.bf16.mxu1 %v2701_v60  ;;  %v512_v4 = vshrl.u32 %v2701_v60, 16  ;;  %v514_v5 = vshll.u32 %v2701_v60, 16  ;;  %2148 = vmatprep.subr.bf16.mxu1 %v2328_v44  ;;  %v521_v9 = vrot.slane %v519_v55, 1  ;;  %v594_v19 = vrot.slane %v2701_v60, 1  ;;  %v2750_v44 = vld [vmem:[%s3045_s1 + $0x200] sm:$0xff]  }
  0x3c   : > { %2085 = vmatpush3.bf16.msra.mxu0 %v2329_v25  ;;  %v409_v25 = vor.u32 %v407_v10, %v406_v16  ;;  %v411_v31 = vshrl.u32 %v372_v20, 16  ;;  %v414_v32 = vshll.u32 %v372_v20, 16  ;;  %v533_v45 = vrot.slane %v531_v30, 1 }
  0x3d   : > { %2086 = vmatprep.subr.bf16.mxu0 %v2331_v48  ;;  %v516_v15 = vrot.slane %v514_v5, 1  ;;  %v373_v48 = vpack.c.bf16 %v364_v39, %v363_v27  ;;  %v349_v56 = vadd.f32 %v2520_v38, %v327_v40  ;;  %v2761_v58 = vsel %vm582_vm2, %v594_v19, %v595_v7 }
  0x3e   : > { %2149 = vmatpush3.bf16.msra.mxu1 %v2330_v59  ;;  %v2740_v37 = vsel %vm2558_vm3, 0, %v409_v25  ;;  %v413_v43 = vrot.slane %v411_v31, 7  ;;  %v598_v10 = vrot.slane %v2721_v26, 1 }
  0x3f   : > { %v517_v24 = vor.u32 %v516_v15, %v512_v4  ;;  %2150 = vmatprep.subr.bf16.mxu1 %v2332_v0  ;;  %1273 = vmatmul.mubr.bf16.gmra.mrb[12].mxu0 %v2637_v11  ;;  %v524_v41 = vshrl.u32 %v2740_v37, 16  ;;  %v526_v42 = vshll.u32 %v2740_v37, 16  ;;  %v418_v59 = vshrl.u32 %v373_v48, 16 }
  0x40   : > { %2087 = vmatpush3.bf16.msra.mxu0 %v2333_v53  ;;  %1370 = vmatmul.mubr.bf16.gmra.mrb[12].mxu1 %v2692_v54  ;;  %v416_v53 = vor.u32 %v414_v32, %v413_v43  ;;  %v463_v55 = vsel %vm2558_vm3, %v413_v43, 0  ;;  %v421_v61 = vshll.u32 %v373_v48, 16  ;;  %v350_v0 = vadd.f32 %v2520_v38, %v328_v50 }
  0x41   : > { %2088 = vmatprep.subr.bf16.mxu0 %v2335_v14  ;;  %v2736_v36 = vsel %vm466_vm4, %v517_v24, %v521_v9  ;;  %1377 = vmatprep.mubr.bf16.mxu1 %v2740_v37  ;;  %v528_v52 = vrot.slane %v526_v42, 1  ;;  %v543_v63 = vshll.u32 %v463_v55, 16  ;;  %v420_v5 = vrot.slane %v418_v59, 7 }
  0x42   : > { %1280 = vmatprep.mubr.bf16.mxu0 %v2736_v36  ;;  %2151 = vmatpush3.bf16.msra.mxu1 %v2334_v28  ;;  %v2765_v62 = vsel %vm2558_vm3, 0, %v416_v53  ;;  %v365_v7 = vmax.f32 %v349_v56, 0.0  ;;  %v366_v9 = vmax.f32 %v350_v0, 0.0  ;;  %v597_v38 = vrot.slane %v2740_v37, 1 }
  0x43   : > { %2152 = vmatprep.subr.bf16.mxu1 %v2336_v33  ;;  %v529_v34 = vor.u32 %v528_v52, %v524_v41  ;;  %v536_v1 = vshrl.u32 %v2765_v62, 16  ;;  %v538_v4 = vshll.u32 %v2765_v62, 16  ;;  %v423_v13 = vor.u32 %v421_v61, %v420_v5 }
  0x44   : > { %2089 = vmatpush3.bf16.msra.mxu0 %v2337_v29  ;;  %v545_v14 = vrot.slane %v543_v63, 1  ;;  %v464_v15 = vsel %vm2558_vm3, %v420_v5, 0  ;;  %v374_v16 = vpack.c.bf16 %v366_v9, %v365_v7  ;;  %v2788_v22 = vsel %vm582_vm2, %v597_v38, %v598_v10  ;;  %v2340_v63 = vld [vmem:[%s3045_s1 + $0x208] sm:$0xff]  }
  0x45   : > { %2218 = vmatprep.subr.bf16.mxu0 %v2750_v44  ;;  %v2772_v6 = vsel %vm466_vm4, %v529_v34, %v533_v45  ;;  %v540_v12 = vrot.slane %v538_v4, 1  ;;  %v2784_v18 = vsel %vm2558_vm3, 0, %v423_v13  ;;  %v555_v23 = vshll.u32 %v464_v15, 16 }
  0x46   : > { %2153 = vmatpush3.bf16.msra.mxu1 %v2338_v51  ;;  %v550_v19 = vshll.u32 %v2784_v18, 16  ;;  %v425_v20 = vshrl.u32 %v374_v16, 16  ;;  %v428_v24 = vshll.u32 %v374_v16, 16  ;;  %v548_v26 = vshrl.u32 %v2784_v18, 16 }
  0x47   : > { %1281 = vmatmul.mubr.bf16.gmra.mrb[16].mxu0 %v2701_v60  ;;  %2250 = vmatprep.subr.bf16.mxu1 %v2750_v44  ;;  %v541_v17 = vor.u32 %v540_v12, %v536_v1  ;;  %v601_v31 = vrot.slane %v463_v55, 1  ;;  %v600_v39 = vrot.slane %v2765_v62, 1  ;;  %v557_v41 = vrot.slane %v555_v23, 1 }
  0x48   : > { %1378 = vmatmul.mubr.bf16.gmra.mrb[16].mxu1 %v2761_v58  ;;  %1288 = vmatprep.mubr.bf16.mxu0 %v2772_v6  ;;  %v552_v27 = vrot.slane %v550_v19, 1  ;;  %v427_v28 = vrot.slane %v425_v20, 7  ;;  %v603_v59 = vrot.slane %v2784_v18, 1  ;;  %v604_v61 = vrot.slane %v464_v15, 1 }
  0x49   : > { %1385 = vmatprep.mubr.bf16.mxu1 %v2765_v62  ;;  %v2791_v25 = vsel %vm466_vm4, %v541_v17, %v545_v14  ;;  %v2812_v53 = vsel %vm582_vm2, %v600_v39, %v601_v31 }
  0x4a   : > { %v430_v29 = vor.u32 %v428_v24, %v427_v28  ;;  %v465_v30 = vsel %vm2558_vm3, %v427_v28, 0  ;;  %v553_v40 = vor.u32 %v552_v27, %v548_v26  ;;  %v2826_v34 = vsel %vm582_vm2, %v603_v59, %v604_v61 }
  0x4b   : > { %v622_v32 = vshll.u32 %v465_v30, 16  ;;  %v630_v33 = vrot.slane %v465_v30, 1 }
  0x4c   : > { %v2803_v42 = vsel %vm2558_vm3, 0, %v430_v29  ;;  %v2815_v55 = vsel %vm466_vm4, %v553_v40, %v557_v41 }
  0x4d   : > { %v615_v43 = vshrl.u32 %v2803_v42, 16  ;;  %v617_v45 = vshll.u32 %v2803_v42, 16  ;;  %v629_v48 = vrot.slane %v2803_v42, 1  ;;  %v624_v51 = vrot.slane %v622_v32, 1 }
  0x4f   : > { %1289 = vmatmul.mubr.bf16.gmra.mrb[20].mxu0 %v2740_v37  ;;  %v619_v50 = vrot.slane %v617_v45, 1  ;;  %v2809_v52 = vsel %vm582_vm2, %v629_v48, %v630_v33 }
  0x50   : > { %1386 = vmatmul.mubr.bf16.gmra.mrb[20].mxu1 %v2788_v22  ;;  %1296 = vmatprep.mubr.bf16.mxu0 %v2791_v25 }
  0x51   : > { %1393 = vmatprep.mubr.bf16.mxu1 %v2784_v18  ;;  %v620_v8 = vor.u32 %v619_v50, %v615_v43 }
  0x53   : > { %v2821_v56 = vsel %vm466_vm4, %v620_v8, %v624_v51 }
  0x57   : > { %1297 = vmatmul.mubr.bf16.gmra.mrb[24].mxu0 %v2765_v62 }
  0x58   : > { %1394 = vmatmul.mubr.bf16.gmra.mrb[24].mxu1 %v2812_v53  ;;  %1304 = vmatprep.mubr.bf16.mxu0 %v2815_v55 }
  0x59   : > { %1401 = vmatprep.mubr.bf16.mxu1 %v2803_v42 }
  0x5f   : > { %1305 = vmatmul.mubr.bf16.gmra.mrb[28].mxu0 %v2784_v18 }
  0x60   : > { %1402 = vmatmul.mubr.bf16.gmra.mrb[28].mxu1 %v2826_v34  ;;  %1442 = vmatprep.mubr.bf16.mxu0 %v2599_v47  ;;  %v2341_v47 = vld [vmem:[%s3045_s1 + $0x210] sm:$0xff]  }
  0x61   : > { %1539 = vmatprep.mubr.bf16.mxu1 %v2651_v21 }
  0x67   : > { %1443 = vmatmul.mubr.bf16.vlgmr.msra.gmra.mrb[32].mxu0 %v2617_v57  ;;  %v2343_v57 = vld [vmem:[%s3045_s1 + $0x220] sm:$0xff]  }
  0x68   : > { %1540 = vmatmul.mubr.bf16.vlgmr.msra.gmra.mrb[32].mxu1 %v2596_v46  ;;  %2219 = vmatpush3.bf16.msra.mxu0 %v2750_v44  ;;  %v2342_v46 = vld [vmem:[%s3045_s1 + $0x218] sm:$0xff]  }
  0x69   : > { %2258 = vmatpush3.bf16.msra.mxu1 %v2750_v44  ;;  %1450 = vmatprep.mubr.bf16.mxu0 %v2666_v35 }
  0x6a   : > { %1547 = vmatprep.mubr.bf16.mxu1 %v2679_v49  ;;  %2220 = vmatprep.subr.bf16.mxu0 %v2340_v63 }
  0x6b   : > { %2251 = vmatprep.subr.bf16.mxu1 %v2340_v63 }
  0x6c   : > { %2221 = vmatpush3.bf16.msra.mxu0 %v2340_v63 }
  0x6d   : > { %2259 = vmatpush3.bf16.msra.mxu1 %v2340_v63  ;;  %2222 = vmatprep.subr.bf16.mxu0 %v2341_v47 }
  0x6e   : > { %2252 = vmatprep.subr.bf16.mxu1 %v2341_v47 }
  0x6f   : > { %1451 = vmatmul.mubr.bf16.gmra.mrb[36].mxu0 %v2651_v21  ;;  %v2344_v21 = vld [vmem:[%s3045_s1 + $0x228] sm:$0xff]  }
  0x70   : > { %1548 = vmatmul.mubr.bf16.gmra.mrb[36].mxu1 %v2637_v11  ;;  %1458 = vmatprep.mubr.bf16.mxu0 %v2692_v54  ;;  %v2345_v11 = vld [vmem:[%s3045_s1 + $0x230] sm:$0xff]  }
  0x71   : > { %1555 = vmatprep.mubr.bf16.mxu1 %v2736_v36  ;;  %2223 = vmatpush3.bf16.msra.mxu0 %v2341_v47 }
  0x72   : > { %2260 = vmatpush3.bf16.msra.mxu1 %v2341_v47  ;;  %2224 = vmatprep.subr.bf16.mxu0 %v2342_v46 }
  0x73   : > { %2253 = vmatprep.subr.bf16.mxu1 %v2342_v46 }
  0x75   : > { %2225 = vmatpush3.bf16.msra.mxu0 %v2342_v46 }
  0x76   : > { %2261 = vmatpush3.bf16.msra.mxu1 %v2342_v46  ;;  %2226 = vmatprep.subr.bf16.mxu0 %v2343_v57 }
  0x77   : > { %1459 = vmatmul.mubr.bf16.gmra.mrb[40].mxu0 %v2679_v49  ;;  %2254 = vmatprep.subr.bf16.mxu1 %v2343_v57  ;;  %v2346_v49 = vld [vmem:[%s3045_s1 + $0x238] sm:$0xff]  }
  0x78   : > { %1556 = vmatmul.mubr.bf16.gmra.mrb[40].mxu1 %v2701_v60  ;;  %1466 = vmatprep.mubr.bf16.mxu0 %v2761_v58 }
  0x79   : > { %1563 = vmatprep.mubr.bf16.mxu1 %v2772_v6  ;;  %2227 = vmatpush3.bf16.msra.mxu0 %v2343_v57 }
  0x7a   : > { %2262 = vmatpush3.bf16.msra.mxu1 %v2343_v57  ;;  %2228 = vmatprep.subr.bf16.mxu0 %v2344_v21 }
  0x7b   : > { %2255 = vmatprep.subr.bf16.mxu1 %v2344_v21 }
  0x7d   : > { %2229 = vmatpush3.bf16.msra.mxu0 %v2344_v21 }
  0x7e   : > { %2263 = vmatpush3.bf16.msra.mxu1 %v2344_v21  ;;  %2230 = vmatprep.subr.bf16.mxu0 %v2345_v11 }
  0x7f   : > { %1467 = vmatmul.mubr.bf16.gmra.mrb[44].mxu0 %v2736_v36  ;;  %2256 = vmatprep.subr.bf16.mxu1 %v2345_v11 }
  0x80   : > { %1564 = vmatmul.mubr.bf16.gmra.mrb[44].mxu1 %v2740_v37  ;;  %1474 = vmatprep.mubr.bf16.mxu0 %v2788_v22 }
  0x81   : > { %1571 = vmatprep.mubr.bf16.mxu1 %v2791_v25  ;;  %2231 = vmatpush3.bf16.msra.mxu0 %v2345_v11 }
  0x82   : > { %2264 = vmatpush3.bf16.msra.mxu1 %v2345_v11  ;;  %2232 = vmatprep.subr.bf16.mxu0 %v2346_v49 }
  0x83   : > { %2257 = vmatprep.subr.bf16.mxu1 %v2346_v49 }
  0x85   : > { %2233 = vmatpush3.bf16.msra.mxu0 %v2346_v49 }
  0x86   : > { %2265 = vmatpush3.bf16.msra.mxu1 %v2346_v49 }
  0x87   : > { %1475 = vmatmul.mubr.bf16.gmra.mrb[48].mxu0 %v2772_v6 }
  0x88   : > { %1572 = vmatmul.mubr.bf16.gmra.mrb[48].mxu1 %v2765_v62  ;;  %1482 = vmatprep.mubr.bf16.mxu0 %v2812_v53 }
  0x89   : > { %1579 = vmatprep.mubr.bf16.mxu1 %v2815_v55 }
  0x8f   : > { %1483 = vmatmul.mubr.bf16.gmra.mrb[52].mxu0 %v2791_v25 }
  0x90   : > { %1580 = vmatmul.mubr.bf16.gmra.mrb[52].mxu1 %v2784_v18  ;;  %1490 = vmatprep.mubr.bf16.mxu0 %v2826_v34 }
  0x91   : > { %1587 = vmatprep.mubr.bf16.mxu1 %v2821_v56 }
  0x97   : > { %1491 = vmatmul.mubr.bf16.gmra.mrb[56].mxu0 %v2815_v55 }
  0x98   : > { %1588 = vmatmul.mubr.bf16.gmra.mrb[56].mxu1 %v2803_v42  ;;  %1498 = vmatprep.mubr.bf16.mxu0 %v2809_v52 }
  0x99   : > { %1595 = vmatprep.mubr.bf16.mxu1 %v2406_v3 }
  0x9f   : > { %1499 = vmatmul.mubr.bf16.gmra.mrb[60].mxu0 %v2821_v56 }
  0xa0   : > { %1596 = vmatmul.mubr.bf16.gmra.mrb[60].mxu1 %v2355_v2  ;;  %2234 = vmatprep.mubr.bf16.mxu0 %v2666_v35 }
  0xa1   : > { %2242 = vmatprep.mubr.bf16.mxu1 %v2812_v53 }
  0xa7   : > { %2235 = vmatmul.mubr.bf16.vlgmr.msra.gmra.mrb[64].mxu0 %v2692_v54  ;;  %v2896_v54 = vld [vmem:[%s3048_s4] ss:$0 sm:$0xff] }
  0xa8   : > { %2243 = vmatmul.mubr.bf16.vlgmr.msra.gmra.mrb[64].mxu1 %v2826_v34  ;;  %2238 = vmatprep.mubr.bf16.mxu0 %v2761_v58 }
  0xa9   : > { %2246 = vmatprep.mubr.bf16.mxu1 %v2809_v52 }
  0xaf   : > { %2239 = vmatmul.mubr.bf16.gmra.mrb[68].mxu0 %v2788_v22 }
  0xb0   : > { %2247 = vmatmul.mubr.bf16.gmra.mrb[68].mxu1 %v2406_v3 }
  0xfa   : > { %v1962_v60 = vpop.f32.mrb[0].mxu0 }
  0xfb   : > { %v1963_v36 = vpop.f32.mrb[1].mxu0  ;;  %v2026_v62 = vpop.f32.mrb[0].mxu1 }
  0xfc   : > { %v1964_v37 = vadd.f32 %v1963_v36, %v1962_v60  ;;  %v1965_v2 = vpop.f32.mrb[2].mxu0  ;;  %v2027_v0 = vpop.f32.mrb[1].mxu1 }
  0xfd   : > { %v1966_v44 = vpop.f32.mrb[3].mxu0  ;;  %v2028_v1 = vadd.f32 %v2027_v0, %v2026_v62  ;;  %v2029_v4 = vpop.f32.mrb[2].mxu1 }
  0xfe   : > { %v1967_v35 = vadd.f32 %v1966_v44, %v1965_v2  ;;  %v1251_v58 = vadd.f32 %v1964_v37, %v2896_v54  ;;  %v2030_v3 = vpop.f32.mrb[3].mxu1 }
  0xff   : > { %v2031_v7 = vadd.f32 %v2030_v3, %v2029_v4 }
 0x100   : > { %v1254_v5 = vadd.f32 %v1967_v35, %v2896_v54  ;;  %v2900_v6 = vadd.f32 %v2028_v1, %v1251_v58 }
 0x102   : > { %v2902_v9 = vadd.f32 %v2031_v7, %v1254_v5  ;;  %v1968_v38 = vpop.f32.mrb[4].mxu0 }
 0x103   : > { %v2032_v10 = vpop.f32.mrb[4].mxu1  ;;  %v1969_v12 = vpop.f32.mrb[5].mxu0 }
 0x104   : > { %v1970_v13 = vadd.f32 %v1969_v12, %v1968_v38  ;;  %v2033_v14 = vpop.f32.mrb[5].mxu1  ;;  %v1971_v15 = vpop.f32.mrb[6].mxu0 }
 0x105   : > { %v2034_v16 = vadd.f32 %v2033_v14, %v2032_v10  ;;  %v2035_v17 = vpop.f32.mrb[6].mxu1  ;;  %v1972_v18 = vpop.f32.mrb[7].mxu0 }
 0x106   : > { %v1259_v19 = vadd.f32 %v1970_v13, %v2896_v54  ;;  %v1973_v20 = vadd.f32 %v1972_v18, %v1971_v15  ;;  %v2036_v22 = vpop.f32.mrb[7].mxu1 }
 0x107   : > { %v2037_v23 = vadd.f32 %v2036_v22, %v2035_v17 }
 0x108   : > { %v2905_v24 = vadd.f32 %v2034_v16, %v1259_v19  ;;  %v1262_v25 = vadd.f32 %v1973_v20, %v2896_v54 }
 0x10a   : > { %v2908_v26 = vadd.f32 %v2037_v23, %v1262_v25  ;;  %v1974_v27 = vpop.f32.mrb[8].mxu0 }
 0x10b   : > { %v2038_v28 = vpop.f32.mrb[8].mxu1  ;;  %v1975_v29 = vpop.f32.mrb[9].mxu0 }
 0x10c   : > { %v1976_v30 = vadd.f32 %v1975_v29, %v1974_v27  ;;  %v2039_v31 = vpop.f32.mrb[9].mxu1  ;;  %v1977_v32 = vpop.f32.mrb[10].mxu0 }
 0x10d   : > { %v2040_v33 = vadd.f32 %v2039_v31, %v2038_v28  ;;  %v2041_v39 = vpop.f32.mrb[10].mxu1  ;;  %v1978_v40 = vpop.f32.mrb[11].mxu0 }
 0x10e   : > { %v1267_v41 = vadd.f32 %v1976_v30, %v2896_v54  ;;  %v1979_v42 = vadd.f32 %v1978_v40, %v1977_v32  ;;  %v2042_v43 = vpop.f32.mrb[11].mxu1 }
 0x10f   : > { %v2043_v45 = vadd.f32 %v2042_v43, %v2041_v39 }
 0x110   : > { %v2911_v48 = vadd.f32 %v2040_v33, %v1267_v41  ;;  %v1270_v50 = vadd.f32 %v1979_v42, %v2896_v54 }
 0x112   : > { %v2914_v51 = vadd.f32 %v2043_v45, %v1270_v50  ;;  %v1980_v52 = vpop.f32.mrb[12].mxu0 }
 0x113   : > { %v2044_v53 = vpop.f32.mrb[12].mxu1  ;;  %v1981_v55 = vpop.f32.mrb[13].mxu0 }
 0x114   : > { %v1982_v8 = vadd.f32 %v1981_v55, %v1980_v52  ;;  %v2045_v56 = vpop.f32.mrb[13].mxu1  ;;  %v1983_v59 = vpop.f32.mrb[14].mxu0 }
 0x115   : > { %v2046_v61 = vadd.f32 %v2045_v56, %v2044_v53  ;;  %v2047_v34 = vpop.f32.mrb[14].mxu1  ;;  %v1984_v63 = vpop.f32.mrb[15].mxu0 }
 0x116   : > { %v1275_v47 = vadd.f32 %v1982_v8, %v2896_v54  ;;  %v1985_v46 = vadd.f32 %v1984_v63, %v1983_v59  ;;  %v2048_v57 = vpop.f32.mrb[15].mxu1 }
 0x117   : > { %v2049_v21 = vadd.f32 %v2048_v57, %v2047_v34 }
 0x118   : > { %v2917_v11 = vadd.f32 %v2046_v61, %v1275_v47  ;;  %v1278_v49 = vadd.f32 %v1985_v46, %v2896_v54 }
 0x11a   : > { %v2920_v60 = vadd.f32 %v2049_v21, %v1278_v49  ;;  %v1986_v36 = vpop.f32.mrb[16].mxu0 }
 0x11b   : > { %v2050_v37 = vpop.f32.mrb[16].mxu1  ;;  %v1987_v2 = vpop.f32.mrb[17].mxu0 }
 0x11c   : > { %v1988_v44 = vadd.f32 %v1987_v2, %v1986_v36  ;;  %v2051_v35 = vpop.f32.mrb[17].mxu1  ;;  %v1989_v62 = vpop.f32.mrb[18].mxu0 }
 0x11d   : > { %v2052_v58 = vadd.f32 %v2051_v35, %v2050_v37  ;;  %v2053_v0 = vpop.f32.mrb[18].mxu1  ;;  %v1990_v1 = vpop.f32.mrb[19].mxu0 }
 0x11e   : > { %v1283_v4 = vadd.f32 %v1988_v44, %v2896_v54  ;;  %v1991_v5 = vadd.f32 %v1990_v1, %v1989_v62  ;;  %v2054_v3 = vpop.f32.mrb[19].mxu1 }
 0x11f   : > { %v2055_v7 = vadd.f32 %v2054_v3, %v2053_v0 }
 0x120   : > { %v2923_v38 = vadd.f32 %v2052_v58, %v1283_v4  ;;  %v1286_v10 = vadd.f32 %v1991_v5, %v2896_v54 }
 0x122   : > { %v2926_v12 = vadd.f32 %v2055_v7, %v1286_v10  ;;  %v1992_v13 = vpop.f32.mrb[20].mxu0 }
 0x123   : > { %v2056_v14 = vpop.f32.mrb[20].mxu1  ;;  %v1993_v15 = vpop.f32.mrb[21].mxu0 }
 0x124   : > { %v1994_v16 = vadd.f32 %v1993_v15, %v1992_v13  ;;  %v2057_v17 = vpop.f32.mrb[21].mxu1  ;;  %v1995_v18 = vpop.f32.mrb[22].mxu0 }
 0x125   : > { %v2058_v19 = vadd.f32 %v2057_v17, %v2056_v14  ;;  %v2059_v20 = vpop.f32.mrb[22].mxu1  ;;  %v1996_v22 = vpop.f32.mrb[23].mxu0 }
 0x126   : > { %v1291_v23 = vadd.f32 %v1994_v16, %v2896_v54  ;;  %v1997_v25 = vadd.f32 %v1996_v22, %v1995_v18  ;;  %v2060_v27 = vpop.f32.mrb[23].mxu1 }
 0x127   : > { %v2061_v28 = vadd.f32 %v2060_v27, %v2059_v20 }
 0x128   : > { %v2929_v29 = vadd.f32 %v2058_v19, %v1291_v23  ;;  %v1294_v30 = vadd.f32 %v1997_v25, %v2896_v54 }
 0x12a   : > { %v2932_v31 = vadd.f32 %v2061_v28, %v1294_v30  ;;  %v1998_v32 = vpop.f32.mrb[24].mxu0 }
 0x12b   : > { %v2062_v33 = vpop.f32.mrb[24].mxu1  ;;  %v1999_v39 = vpop.f32.mrb[25].mxu0 }
 0x12c   : > { %v2000_v40 = vadd.f32 %v1999_v39, %v1998_v32  ;;  %v2063_v41 = vpop.f32.mrb[25].mxu1  ;;  %v2001_v42 = vpop.f32.mrb[26].mxu0 }
 0x12d   : > { %v2064_v43 = vadd.f32 %v2063_v41, %v2062_v33  ;;  %v2065_v45 = vpop.f32.mrb[26].mxu1  ;;  %v2002_v50 = vpop.f32.mrb[27].mxu0 }
 0x12e   : > { %v1299_v52 = vadd.f32 %v2000_v40, %v2896_v54  ;;  %v2003_v53 = vadd.f32 %v2002_v50, %v2001_v42  ;;  %v2066_v55 = vpop.f32.mrb[27].mxu1 }
 0x12f   : > { %v2067_v8 = vadd.f32 %v2066_v55, %v2065_v45 }
 0x130   : > { %v2935_v56 = vadd.f32 %v2064_v43, %v1299_v52  ;;  %v1302_v59 = vadd.f32 %v2003_v53, %v2896_v54 }
 0x132   : > { %v2938_v61 = vadd.f32 %v2067_v8, %v1302_v59  ;;  %v2004_v34 = vpop.f32.mrb[28].mxu0 }
 0x133   : > { %v2068_v63 = vpop.f32.mrb[28].mxu1  ;;  %v2005_v47 = vpop.f32.mrb[29].mxu0 }
 0x134   : > { %v2006_v46 = vadd.f32 %v2005_v47, %v2004_v34  ;;  %v2069_v57 = vpop.f32.mrb[29].mxu1  ;;  %v2007_v21 = vpop.f32.mrb[30].mxu0 }
 0x135   : > { %v2070_v49 = vadd.f32 %v2069_v57, %v2068_v63  ;;  %v2071_v36 = vpop.f32.mrb[30].mxu1  ;;  %v2008_v37 = vpop.f32.mrb[31].mxu0 }
 0x136   : > { %v1307_v2 = vadd.f32 %v2006_v46, %v2896_v54  ;;  %v2009_v44 = vadd.f32 %v2008_v37, %v2007_v21  ;;  %v2072_v35 = vpop.f32.mrb[31].mxu1 }
 0x137   : > { %v2073_v62 = vadd.f32 %v2072_v35, %v2071_v36 }
 0x138   : > { %v2941_v58 = vadd.f32 %v2070_v49, %v1307_v2  ;;  %v1310_v0 = vadd.f32 %v2009_v44, %v2896_v54 }
 0x13a   : > { %v2944_v1 = vadd.f32 %v2073_v62, %v1310_v0  ;;  %v2090_v4 = vpop.f32.mrb[32].mxu0 }
 0x13b   : > { %v2154_v5 = vpop.f32.mrb[32].mxu1  ;;  %v2091_v3 = vpop.f32.mrb[33].mxu0 }
 0x13c   : > { %v2092_v7 = vadd.f32 %v2091_v3, %v2090_v4  ;;  %v2155_v10 = vpop.f32.mrb[33].mxu1  ;;  %v2093_v13 = vpop.f32.mrb[34].mxu0 }
 0x13d   : > { %v2156_v14 = vadd.f32 %v2155_v10, %v2154_v5  ;;  %v2157_v15 = vpop.f32.mrb[34].mxu1  ;;  %v2094_v16 = vpop.f32.mrb[35].mxu0 }
 0x13e   : > { %v1445_v17 = vadd.f32 %v2092_v7, %v2900_v6  ;;  %v2095_v18 = vadd.f32 %v2094_v16, %v2093_v13  ;;  %v2158_v19 = vpop.f32.mrb[35].mxu1 }
 0x13f   : > { %v2159_v20 = vadd.f32 %v2158_v19, %v2157_v15 }
 0x140   : > { %v1448_v22 = vadd.f32 %v2095_v18, %v2902_v9  ;;  %v2948_v23 = vadd.f32 %v2156_v14, %v1445_v17 }
 0x142   : > { %v2096_v54 = vpop.f32.mrb[36].mxu0  ;;  %v2950_v25 = vadd.f32 %v2159_v20, %v1448_v22 }
 0x143   : > { %v2160_v27 = vpop.f32.mrb[36].mxu1  ;;  %v2097_v28 = vpop.f32.mrb[37].mxu0 }
 0x144   : > { %v2098_v30 = vadd.f32 %v2097_v28, %v2096_v54  ;;  %v2161_v32 = vpop.f32.mrb[37].mxu1  ;;  %v2099_v33 = vpop.f32.mrb[38].mxu0 }
 0x145   : > { %v2162_v39 = vadd.f32 %v2161_v32, %v2160_v27  ;;  %v2163_v40 = vpop.f32.mrb[38].mxu1  ;;  %v2100_v41 = vpop.f32.mrb[39].mxu0 }
 0x146   : > { %v1453_v6 = vadd.f32 %v2098_v30, %v2905_v24  ;;  %v2101_v42 = vadd.f32 %v2100_v41, %v2099_v33  ;;  %v2164_v43 = vpop.f32.mrb[39].mxu1 }
 0x147   : > { %v2165_v45 = vadd.f32 %v2164_v43, %v2163_v40 }
 0x148   : > { %v1456_v9 = vadd.f32 %v2101_v42, %v2908_v26  ;;  %v2954_v50 = vadd.f32 %v2162_v39, %v1453_v6 }
 0x14a   : > { %v2102_v52 = vpop.f32.mrb[40].mxu0  ;;  %v2956_v53 = vadd.f32 %v2165_v45, %v1456_v9 }
 0x14b   : > { %v2166_v55 = vpop.f32.mrb[40].mxu1  ;;  %v2103_v8 = vpop.f32.mrb[41].mxu0 }
 0x14c   : > { %v2104_v59 = vadd.f32 %v2103_v8, %v2102_v52  ;;  %v2167_v34 = vpop.f32.mrb[41].mxu1  ;;  %v2105_v63 = vpop.f32.mrb[42].mxu0 }
 0x14d   : > { %v2168_v47 = vadd.f32 %v2167_v34, %v2166_v55  ;;  %v2169_v46 = vpop.f32.mrb[42].mxu1  ;;  %v2106_v57 = vpop.f32.mrb[43].mxu0 }
 0x14e   : > { %v1461_v24 = vadd.f32 %v2104_v59, %v2911_v48  ;;  %v2107_v21 = vadd.f32 %v2106_v57, %v2105_v63  ;;  %v2170_v49 = vpop.f32.mrb[43].mxu1 }
 0x14f   : > { %v2171_v36 = vadd.f32 %v2170_v49, %v2169_v46 }
 0x150   : > { %v1464_v26 = vadd.f32 %v2107_v21, %v2914_v51  ;;  %v2960_v37 = vadd.f32 %v2168_v47, %v1461_v24 }
 0x152   : > { %v2108_v2 = vpop.f32.mrb[44].mxu0  ;;  %v2962_v44 = vadd.f32 %v2171_v36, %v1464_v26 }
 0x153   : > { %v2172_v35 = vpop.f32.mrb[44].mxu1  ;;  %v2109_v62 = vpop.f32.mrb[45].mxu0 }
 0x154   : > { %v2110_v0 = vadd.f32 %v2109_v62, %v2108_v2  ;;  %v2173_v4 = vpop.f32.mrb[45].mxu1  ;;  %v2111_v5 = vpop.f32.mrb[46].mxu0 }
 0x155   : > { %v2174_v3 = vadd.f32 %v2173_v4, %v2172_v35  ;;  %v2175_v7 = vpop.f32.mrb[46].mxu1  ;;  %v2112_v10 = vpop.f32.mrb[47].mxu0 }
 0x156   : > { %v1469_v48 = vadd.f32 %v2110_v0, %v2917_v11  ;;  %v2113_v13 = vadd.f32 %v2112_v10, %v2111_v5  ;;  %v2176_v14 = vpop.f32.mrb[47].mxu1 }
 0x157   : > { %v2177_v15 = vadd.f32 %v2176_v14, %v2175_v7 }
 0x158   : > { %v1472_v51 = vadd.f32 %v2113_v13, %v2920_v60  ;;  %v2966_v16 = vadd.f32 %v2174_v3, %v1469_v48 }
 0x15a   : > { %v2114_v17 = vpop.f32.mrb[48].mxu0  ;;  %v2968_v18 = vadd.f32 %v2177_v15, %v1472_v51 }
 0x15b   : > { %v2178_v19 = vpop.f32.mrb[48].mxu1  ;;  %v2115_v20 = vpop.f32.mrb[49].mxu0 }
 0x15c   : > { %v2116_v22 = vadd.f32 %v2115_v20, %v2114_v17  ;;  %v2179_v54 = vpop.f32.mrb[49].mxu1  ;;  %v2117_v27 = vpop.f32.mrb[50].mxu0 }
 0x15d   : > { %v2180_v28 = vadd.f32 %v2179_v54, %v2178_v19  ;;  %v2181_v30 = vpop.f32.mrb[50].mxu1  ;;  %v2118_v32 = vpop.f32.mrb[51].mxu0 }
 0x15e   : > { %v1477_v11 = vadd.f32 %v2116_v22, %v2923_v38  ;;  %v2119_v33 = vadd.f32 %v2118_v32, %v2117_v27  ;;  %v2182_v39 = vpop.f32.mrb[51].mxu1 }
 0x15f   : > { %v2183_v40 = vadd.f32 %v2182_v39, %v2181_v30 }
 0x160   : > { %v1480_v60 = vadd.f32 %v2119_v33, %v2926_v12  ;;  %v2972_v41 = vadd.f32 %v2180_v28, %v1477_v11  ;;  %v1703_v33 = vld [vmem:[%s2989_s28 + $0x10] sm:$0xff] }
 0x162   : > { %v2120_v6 = vpop.f32.mrb[52].mxu0  ;;  %v2974_v42 = vadd.f32 %v2183_v40, %v1480_v60  ;;  %v1711_v60 = vld [vmem:[%s2989_s28 + $0x50] sm:$0xff] }
 0x163   : > { %v2184_v43 = vpop.f32.mrb[52].mxu1  ;;  %v2121_v45 = vpop.f32.mrb[53].mxu0 }
 0x164   : > { %v2122_v9 = vadd.f32 %v2121_v45, %v2120_v6  ;;  %v2185_v52 = vpop.f32.mrb[53].mxu1  ;;  %v2123_v55 = vpop.f32.mrb[54].mxu0 }
 0x165   : > { %v2186_v8 = vadd.f32 %v2185_v52, %v2184_v43  ;;  %v2187_v59 = vpop.f32.mrb[54].mxu1  ;;  %v2124_v34 = vpop.f32.mrb[55].mxu0  ;;  %v1701_v43 = vld [vmem:[%s2989_s28] sm:$0xff] }
 0x166   : > { %v1485_v38 = vadd.f32 %v2122_v9, %v2929_v29  ;;  %v2125_v63 = vadd.f32 %v2124_v34, %v2123_v55  ;;  %v2188_v47 = vpop.f32.mrb[55].mxu1  ;;  %v1709_v52 = vld [vmem:[%s2989_s28 + $0x40] sm:$0xff] }
 0x167   : > { %v2189_v46 = vadd.f32 %v2188_v47, %v2187_v59 }
 0x168   : > { %v1488_v12 = vadd.f32 %v2125_v63, %v2932_v31  ;;  %v1582_v57 = vadd.f32 %v2186_v8, %v1485_v38  ;;  %v1712_v63 = vld [vmem:[%s2989_s28 + $0x58] sm:$0xff] }
 0x16a   : > { %v2126_v24 = vpop.f32.mrb[56].mxu0  ;;  %v1585_v21 = vadd.f32 %v2189_v46, %v1488_v12  ;;  %v1702_v46 = vld [vmem:[%s2989_s28 + $0x8] sm:$0xff] }
 0x16b   : > { %v2190_v49 = vpop.f32.mrb[56].mxu1  ;;  %v2127_v36 = vpop.f32.mrb[57].mxu0 }
 0x16c   : > { %v2128_v26 = vadd.f32 %v2127_v36, %v2126_v24  ;;  %v2191_v2 = vpop.f32.mrb[57].mxu1  ;;  %v2129_v35 = vpop.f32.mrb[58].mxu0 }
 0x16d   : > { %v2192_v62 = vadd.f32 %v2191_v2, %v2190_v49  ;;  %v2193_v0 = vpop.f32.mrb[58].mxu1  ;;  %v2130_v4 = vpop.f32.mrb[59].mxu0 }
 0x16e   : > { %v1493_v5 = vadd.f32 %v2128_v26, %v2935_v56  ;;  %v2131_v29 = vadd.f32 %v2130_v4, %v2129_v35  ;;  %v2194_v3 = vpop.f32.mrb[59].mxu1 }
 0x16f   : > { %v2195_v7 = vadd.f32 %v2194_v3, %v2193_v0 }
 0x170   : > { %v1496_v10 = vadd.f32 %v2131_v29, %v2938_v61  ;;  %v2980_v31 = vadd.f32 %v2192_v62, %v1493_v5  ;;  %v1707_v62 = vld [vmem:[%s2989_s28 + $0x30] sm:$0xff]  ;;  %v1705_v29 = vld [vmem:[%s2989_s28 + $0x20] sm:$0xff] }
 0x172   : > { %v2132_v48 = vpop.f32.mrb[60].mxu0  ;;  %v2982_v13 = vadd.f32 %v2195_v7, %v1496_v10 }
 0x173   : > { %v2196_v14 = vpop.f32.mrb[60].mxu1  ;;  %v2133_v15 = vpop.f32.mrb[61].mxu0 }
 0x174   : > { %v2134_v51 = vadd.f32 %v2133_v15, %v2132_v48  ;;  %v2197_v17 = vpop.f32.mrb[61].mxu1  ;;  %v2135_v19 = vpop.f32.mrb[62].mxu0  ;;  %v1713_v48 = vld [vmem:[%s2989_s28 + $0x60] sm:$0xff]  ;;  %v1708_v15 = vld [vmem:[%s2989_s28 + $0x38] sm:$0xff] }
 0x175   : > { %v2198_v20 = vadd.f32 %v2197_v17, %v2196_v14  ;;  %v2199_v22 = vpop.f32.mrb[62].mxu1  ;;  %v2136_v54 = vpop.f32.mrb[63].mxu0 }
 0x176   : > { %v1501_v56 = vadd.f32 %v2134_v51, %v2941_v58  ;;  %v2137_v27 = vadd.f32 %v2136_v54, %v2135_v19  ;;  %v2200_v28 = vpop.f32.mrb[63].mxu1  ;;  %v1706_v54 = vld [vmem:[%s2989_s28 + $0x28] sm:$0xff] }
 0x177   : > { %v2201_v61 = vadd.f32 %v2200_v28, %v2199_v22 }
 0x178   : > { %v1504_v30 = vadd.f32 %v2137_v27, %v2944_v1  ;;  %v1598_v32 = vadd.f32 %v2198_v20, %v1501_v56  ;;  %v1716_v20 = vld [vmem:[%s2989_s28 + $0x78] sm:$0xff] }
 0x17a   : > { %v2236_v11 = vpop.f32.mrb[64].mxu0  ;;  %v1601_v39 = vadd.f32 %v2201_v61, %v1504_v30 }
 0x17b   : > { %v1647_v58 = vadd.f32 %v2236_v11, %v2954_v50  ;;  %v2244_v40 = vpop.f32.mrb[64].mxu1  ;;  %v1638_v6 = vpop.f32.mrb[65].mxu0  ;;  %v1704_v50 = vld [vmem:[%s2989_s28 + $0x18] sm:$0xff] }
 0x17c   : > { %v1679_v45 = vadd.f32 %v2244_v40, %v1582_v57  ;;  %v1639_v1 = vadd.f32 %v1638_v6, %v2948_v23  ;;  %v1670_v9 = vpop.f32.mrb[65].mxu1  ;;  %v2237_v55 = vpop.f32.mrb[66].mxu0 }
 0x17d   : > { %v1719_v8 = vadd.f32 %v1703_v33, %v1647_v58  ;;  %v1671_v59 = vadd.f32 %v1670_v9, %v2972_v41  ;;  %v1650_v34 = vadd.f32 %v2237_v55, %v2956_v53  ;;  %v2245_v38 = vpop.f32.mrb[66].mxu1  ;;  %v1641_v47 = vpop.f32.mrb[67].mxu0  ;;  %v1710_v41 = vld [vmem:[%s2989_s28 + $0x48] sm:$0xff] }
 0x17e   : > { %v1727_v23 = vadd.f32 %v1711_v60, %v1679_v45  ;;  %v1717_v12 = vadd.f32 %v1701_v43, %v1639_v1  ;;  %v1682_v57 = vadd.f32 %v2245_v38, %v1585_v21  ;;  %v1642_v24 = vadd.f32 %v1641_v47, %v2950_v25  ;;  %v1673_v49 = vpop.f32.mrb[67].mxu1 }
 0x17f   : > { %1735 = vst [vmem:[%s2999_s30 + $0x10] sm:$0xff] %v1719_v8  ;;  %v1725_v53 = vadd.f32 %v1709_v52, %v1671_v59  ;;  %v1720_v36 = vadd.f32 %v1704_v50, %v1650_v34  ;;  %v1674_v26 = vadd.f32 %v1673_v49, %v2974_v42  ;;  %v1715_v42 = vld [vmem:[%s2989_s28 + $0x70] sm:$0xff] }
 0x180   : > { %1743 = vst [vmem:[%s2999_s30 + $0x50] sm:$0xff] %v1727_v23  ;;  %1733 = vst [vmem:[%s2999_s30] sm:$0xff] %v1717_v12  ;;  %v1728_v2 = vadd.f32 %v1712_v63, %v1682_v57  ;;  %v1718_v35 = vadd.f32 %v1702_v46, %v1642_v24 }
 0x181   : > { %1741 = vst [vmem:[%s2999_s30 + $0x40] sm:$0xff] %v1725_v53  ;;  %1736 = vst [vmem:[%s2999_s30 + $0x18] sm:$0xff] %v1720_v36  ;;  %v1726_v21 = vadd.f32 %v1710_v41, %v1674_v26 }
 0x182   : > { %1744 = vst [vmem:[%s2999_s30 + $0x58] sm:$0xff] %v1728_v2  ;;  %1734 = vst [vmem:[%s2999_s30 + $0x8] sm:$0xff] %v1718_v35  ;;  %v2240_v25 = vpop.f32.mrb[68].mxu0 }
 0x183   : > { %1742 = vst [vmem:[%s2999_s30 + $0x48] sm:$0xff] %v1726_v21  ;;  %v1663_v0 = vadd.f32 %v2240_v25, %v2966_v16  ;;  %v2248_v4 = vpop.f32.mrb[68].mxu1  ;;  %v1654_v5 = vpop.f32.mrb[69].mxu0 }
 0x184   : > { %v1695_v3 = vadd.f32 %v2248_v4, %v1598_v32  ;;  %v1655_v7 = vadd.f32 %v1654_v5, %v2960_v37  ;;  %v1686_v10 = vpop.f32.mrb[69].mxu1  ;;  %v2241_v14 = vpop.f32.mrb[70].mxu0 }
 0x185   : > { %v1723_v51 = vadd.f32 %v1707_v62, %v1663_v0  ;;  %v1687_v17 = vadd.f32 %v1686_v10, %v2980_v31  ;;  %v1666_v16 = vadd.f32 %v2241_v14, %v2968_v18  ;;  %v2249_v19 = vpop.f32.mrb[70].mxu1  ;;  %v1657_v22 = vpop.f32.mrb[71].mxu0  ;;  %v1714_v31 = vld [vmem:[%s2989_s28 + $0x68] sm:$0xff] }
 0x186   : > { %v1731_v37 = vadd.f32 %v1715_v42, %v1695_v3  ;;  %v1721_v56 = vadd.f32 %v1705_v29, %v1655_v7  ;;  %v1698_v27 = vadd.f32 %v2249_v19, %v1601_v39  ;;  %v1658_v28 = vadd.f32 %v1657_v22, %v2962_v44  ;;  %v1689_v61 = vpop.f32.mrb[71].mxu1 }
 0x187   : > { %1739 = vst [vmem:[%s2999_s30 + $0x30] sm:$0xff] %v1723_v51  ;;  %v1729_v30 = vadd.f32 %v1713_v48, %v1687_v17  ;;  %v1724_v18 = vadd.f32 %v1708_v15, %v1666_v16  ;;  %v1690_v32 = vadd.f32 %v1689_v61, %v2982_v13 }
 0x188   : > { %1747 = vst [vmem:[%s2999_s30 + $0x70] sm:$0xff] %v1731_v37  ;;  %1737 = vst [vmem:[%s2999_s30 + $0x20] sm:$0xff] %v1721_v56  ;;  %v1732_v11 = vadd.f32 %v1716_v20, %v1698_v27  ;;  %v1722_v33 = vadd.f32 %v1706_v54, %v1658_v28 }
 0x189   : > { %1745 = vst [vmem:[%s2999_s30 + $0x60] sm:$0xff] %v1729_v30  ;;  %1740 = vst [vmem:[%s2999_s30 + $0x38] sm:$0xff] %v1724_v18  ;;  %v1730_v58 = vadd.f32 %v1714_v31, %v1690_v32 }
 0x18a   : > { %1748 = vst [vmem:[%s2999_s30 + $0x78] sm:$0xff] %v1732_v11  ;;  %1738 = vst [vmem:[%s2999_s30 + $0x28] sm:$0xff] %v1722_v33 }
 0x18b   : > { %1746 = vst [vmem:[%s2999_s30 + $0x68] sm:$0xff] %v1730_v58 }
 0x18c PF: > { %s16_s21 = sadd.s32 1, %s2353_s21  }
 0x18d   : > { %p13_p4 = scmp.ge.s32.totalorder %s16_s21, 4  }
 0x18f   :  { %15 = sbr.rel (!%p13_p4) target bundleno = 1 (0x1), region = 77 }

</bundles_post_ra>
